<compile_context>
chip_gen: v5e
topology: v5e:2x2
jax: 0.10.0
libtpu: 0.0.40
codegen_flags: <defaults>
</compile_context>

<pallas_src>
import functools

import jax
import jax.numpy as jnp
import numpy as np
from jax import lax
from jax.experimental import pallas as pl
from jax.experimental.pallas import tpu as pltpu


def _round_up(x, m):
    return ((x + m - 1) // m) * m


def _const_index_map(ndim):
    return lambda i: (0,) * ndim


# ----------------------------------------------------------------------------
# The single fused kernel (runs once per batch tile of `bt` samples)
# ----------------------------------------------------------------------------
def _fused_cnn_kernel(*refs, bt, with_loss):
    idx = 0
    x1_ref = refs[idx]; idx += 1          # (64*bt, 16) conv1 im2col (9 taps + pad)
    if with_loss:
        tgt_ref = refs[idx]; idx += 1     # (bt, 1) int32, -1 marks padded rows
    (w1_ref, b1_ref, w2_ref, b2_ref,
     wfc1_ref, bfc1_ref, wfc2_ref, bfc2_ref) = refs[idx:idx + 8]
    idx += 8
    logits_ref = refs[idx]; idx += 1      # (bt, 128) f32, lane-dense
    if with_loss:
        loss_ref = refs[idx]              # (bt, 1) f32 per-sample CE partials

    f32 = jnp.float32
    cdtype = x1_ref.dtype                 # MXU operand dtype (bf16 by default)

    def row_block(a, p):                  # static, sublane-aligned BT-row slice
        return a[p * bt:(p + 1) * bt, :]

    def pool_relu(blocks):                # 2x2 max-pool + ReLU on (bt, 64) tiles
        m = jnp.maximum(jnp.maximum(blocks[0], blocks[1]),
                        jnp.maximum(blocks[2], blocks[3]))
        return jnp.maximum(m, 0.0)

    # ---- conv1: one MXU GEMM over the wrapper-built im2col ------------------
    # rows = (h*8 + w)*bt + b for the 8x8 conv1 output grid.
    y1 = jnp.dot(x1_ref[...], w1_ref[...],
                 preferred_element_type=f32) + b1_ref[...]           # (64*bt, 64)

    # ---- pool1 (2x2) + relu -> 16 tiles of (bt, 64), cast to bf16 -----------
    h1 = {}
    for i in range(4):
        for j in range(4):
            ps = [(2 * i) * 8 + 2 * j, (2 * i) * 8 + 2 * j + 1,
                  (2 * i + 1) * 8 + 2 * j, (2 * i + 1) * 8 + 2 * j + 1]
            h1[(i, j)] = pool_relu([row_block(y1, p) for p in ps]).astype(cdtype)

    # ---- conv2: 9 stacked GEMMs, 16 output positions stacked on sublanes ----
    zero_tile = jnp.zeros((bt, 64), cdtype)
    y2 = None
    for kh in range(3):
        for kw in range(3):
            srcs = []
            for h in range(4):
                for w in range(4):
                    hh, ww = h + kh - 1, w + kw - 1
                    srcs.append(h1[(hh, ww)] if 0 <= hh < 4 and 0 <= ww < 4
                                else zero_tile)
            slab = jnp.concatenate(srcs, axis=0)                      # (16*bt, 64)
            d = jnp.dot(slab, w2_ref[kh * 3 + kw],
                        preferred_element_type=f32)                   # (16*bt, 64)
            y2 = d if y2 is None else y2 + d
    y2 = y2 + b2_ref[...]                 # rows = (h*4 + w)*bt + b

    # ---- pool2 (2x2) + relu -> 4 tiles of (bt, 64) ---------------------------
    h2 = {}
    for i in range(2):
        for j in range(2):
            qs = [(2 * i) * 4 + 2 * j, (2 * i) * 4 + 2 * j + 1,
                  (2 * i + 1) * 4 + 2 * j, (2 * i + 1) * 4 + 2 * j + 1]
            h2[(i, j)] = pool_relu([row_block(y2, q) for q in qs]).astype(cdtype)

    # ---- fc1: single GEMM, K=256 (weight rows pre-permuted for NCHW flatten) -
    xfc = jnp.concatenate([h2[(0, 0)], h2[(0, 1)], h2[(1, 0)], h2[(1, 1)]],
                          axis=1)                                      # (bt, 256)
    z = jnp.dot(xfc, wfc1_ref[...], preferred_element_type=f32) + bfc1_ref[...]
    z = jnp.maximum(z, 0.0).astype(cdtype)                             # (bt, 128)

    # ---- fc2: lane-dense (bt, 128) logits (padded classes biased to -1e30) ---
    logits = jnp.dot(z, wfc2_ref[...],
                     preferred_element_type=f32) + bfc2_ref[...]       # (bt, 128)
    logits_ref[...] = logits

    # ---- vectorized softmax cross-entropy, per-sample partial losses ---------
    if with_loss:
        m = jnp.max(logits, axis=-1, keepdims=True)
        lse = m + jnp.log(jnp.sum(jnp.exp(logits - m), axis=-1, keepdims=True))
        tgt = tgt_ref[...]                                             # (bt, 1)
        col = lax.broadcasted_iota(jnp.int32, logits.shape, 1)         # (bt, 128)
        tgt_logit = jnp.sum(jnp.where(col == tgt, logits, 0.0),
                            axis=-1, keepdims=True)                    # (bt, 1)
        valid = (tgt >= 0).astype(f32)                                 # (bt, 1)
        loss_ref[...] = (lse - tgt_logit) * valid


# ----------------------------------------------------------------------------
# pallas_call wrapper
# ----------------------------------------------------------------------------
def cnn_forward(x, params, targets=None, *, batch_tile=128):
    """CNNModel forward.  x: (B, 8, 8) float; targets: optional (B,) ints."""
    B, H, W = x.shape
    assert H == 8 and W == 8, "fc1(256) implies an 8x8 input"
    with_loss = targets is not None
    num_classes = params["num_classes"]
    cdtype = params["w1"].dtype

    # Batch tile: multiple of 8 sublanes, up to `batch_tile` (128 default).
    BT = _round_up(min(batch_tile, _round_up(B, 8)), 8)
    n_tiles = pl.cdiv(B, BT)
    Bp = n_tiles * BT

    # conv1 im2col built once in the wrapper (pure gather = layout plumbing):
    # rows = tile*64*BT + (h*8 + w)*BT + b_local; 9 taps (+7 zero pad) on lanes.
    xf = jnp.pad(x.astype(jnp.float32), ((0, Bp - B), (0, 0), (0, 0)))
    xs = jnp.pad(xf, ((0, 0), (1, 1), (1, 1)))                       # (Bp, 10, 10)
    cols = jnp.stack([xs[:, kh:kh + 8, kw:kw + 8]
                      for kh in range(3) for kw in range(3)], axis=-1)  # (Bp,8,8,9)
    cols = jnp.pad(cols, ((0, 0), (0, 0), (0, 0), (0, 7)))           # taps 9 -> 16
    x1 = (cols.reshape(n_tiles, BT, 64, 16)
              .transpose(0, 2, 1, 3)
              .reshape(n_tiles * 64 * BT, 16)
              .astype(cdtype))

    inputs = [x1]
    in_specs = [pl.BlockSpec((64 * BT, 16), lambda i: (i, 0))]
    if with_loss:
        t = jnp.pad(targets.astype(jnp.int32).reshape(B), (0, Bp - B),
                    constant_values=-1).reshape(Bp, 1)
        inputs.append(t)
        in_specs.append(pl.BlockSpec((BT, 1), lambda i: (i, 0)))
    for k in ("w1", "b1", "w2", "b2", "wfc1", "bfc1", "wfc2", "bfc2"):
        wgt = params[k]
        inputs.append(wgt)
        in_specs.append(pl.BlockSpec(wgt.shape, _const_index_map(wgt.ndim)))

    out_shapes = [jax.ShapeDtypeStruct((Bp, 128), jnp.float32)]
    out_specs = [pl.BlockSpec((BT, 128), lambda i: (i, 0))]
    if with_loss:
        out_shapes.append(jax.ShapeDtypeStruct((Bp, 1), jnp.float32))
        out_specs.append(pl.BlockSpec((BT, 1), lambda i: (i, 0)))

    grid_spec = pltpu.PrefetchScalarGridSpec(
        num_scalar_prefetch=0,
        grid=(n_tiles,),
        in_specs=in_specs,
        out_specs=tuple(out_specs),
    )
    kernel = functools.partial(_fused_cnn_kernel, bt=BT, with_loss=with_loss)
    results = pl.pallas_call(
        kernel,
        grid_spec=grid_spec,
        out_shape=tuple(out_shapes),
        compiler_params=pltpu.CompilerParams(
            dimension_semantics=("parallel",),
            vmem_limit_bytes=48 * 1024 * 1024),
    )(*inputs)
    if not isinstance(results, (tuple, list)):
        results = (results,)

    out = {"logits": results[0][:B, :num_classes]}
    if with_loss:
        out["loss"] = jnp.sum(results[1]) / B      # mean over the true batch
    return out


# ----------------------------------------------------------------------------
# Parameters: torch-layout init + one-time layout prep (hoisted out of forward)
# ----------------------------------------------------------------------------
def init_params(num_classes=6, seed=1234):
    key = jax.random.PRNGKey(seed)
    ks = jax.random.split(key, 8)

    def n(k, shape, fan_in):
        return jax.random.normal(k, shape, jnp.float32) / jnp.sqrt(fan_in)

    return {
        "conv1_w": n(ks[0], (64, 1, 3, 3), 9.0),
        "conv1_b": n(ks[1], (64,), 9.0),
        "conv2_w": n(ks[2], (64, 64, 3, 3), 576.0),
        "conv2_b": n(ks[3], (64,), 576.0),
        "fc1_w":   n(ks[4], (128, 256), 256.0),     # PyTorch (out, in)
        "fc1_b":   n(ks[5], (128,), 256.0),
        "fc2_w":   n(ks[6], (num_classes, 128), 128.0),
        "fc2_b":   n(ks[7], (num_classes,), 128.0),
    }


def prepare_params(torch_params, compute_dtype=jnp.bfloat16):
    """One-time weight relayout (bf16 MXU operands, f32 biases):
       - conv1 -> (tap[9->16], cout) matrix, conv2 -> (tap, cin, cout),
       - fc1 rows permuted so the kernel's (pos-major, channel-minor) flatten
         matches PyTorch's NCHW .view(B, -1),
       - fc2 transposed and zero-padded to 128 lanes, padded bias = -1e30."""
    p = torch_params
    c1 = p["conv1_w"].shape[0]
    c2 = p["conv2_w"].shape[0]
    ci2 = p["conv2_w"].shape[1]
    nh = p["fc1_w"].shape[0]
    ncls = p["fc2_w"].shape[0]
    assert ncls <= 128
    NEG = -1e30

    w1 = jnp.pad(p["conv1_w"].reshape(c1, 9).T, ((0, 7), (0, 0)))         # (16, 64)
    w2 = jnp.transpose(p["conv2_w"], (2, 3, 1, 0)).reshape(9, ci2, c2)    # (9,64,64)
    wfc1 = jnp.transpose(p["fc1_w"].reshape(nh, c2, 2, 2),
                         (2, 3, 1, 0)).reshape(4 * c2, nh)                # (256,128)
    wfc2 = jnp.pad(p["fc2_w"].T, ((0, 0), (0, 128 - ncls)))               # (128,128)
    bfc2 = jnp.concatenate(
        [p["fc2_b"], jnp.full((128 - ncls,), NEG, jnp.float32)]).reshape(1, 128)

    return {
        "w1": w1.astype(compute_dtype),
        "b1": p["conv1_b"].reshape(1, c1).astype(jnp.float32),
        "w2": w2.astype(compute_dtype),
        "b2": p["conv2_b"].reshape(1, c2).astype(jnp.float32),
        "wfc1": wfc1.astype(compute_dtype),
        "bfc1": p["fc1_b"].reshape(1, nh).astype(jnp.float32),
        "wfc2": wfc2.astype(compute_dtype),
        "bfc2": bfc2.astype(jnp.float32),
        "num_classes": ncls,
    }


# ----------------------------------------------------------------------------
# Pure-JAX NCHW reference (same bf16 rounding of matmul operands) for checking
# ----------------------------------------------------------------------------
def reference_forward(x, torch_params, targets=None, compute_dtype=jnp.bfloat16):
    p = torch_params

    def cast(a):
        return a.astype(compute_dtype).astype(jnp.float32)

    def conv3x3(inp, w, b):                    # inp (B, Cin, H, H), w (Co, Cin, 3, 3)
        Hh = inp.shape[2]
        xp = jnp.pad(inp, ((0, 0), (0, 0), (1, 1), (1, 1)))
        cols = jnp.stack([xp[:, :, kh:kh + Hh, kw:kw + Hh]
                          for kh in range(3) for kw in range(3)], axis=2)
        wm = w.reshape(w.shape[0], w.shape[1], 9)
        return (jnp.einsum("bcthw,oct->bohw", cast(cols), cast(wm))
                + b[None, :, None, None])

    def pool2(a):
        Bn, C, Hh, Ww = a.shape
        return a.reshape(Bn, C, Hh // 2, 2, Ww // 2, 2).max(axis=(3, 5))

    B = x.shape[0]
    a = x.astype(jnp.float32)[:, None, :, :]
    a = jnp.maximum(pool2(conv3x3(a, p["conv1_w"], p["conv1_b"])), 0.0)
    a = jnp.maximum(pool2(conv3x3(a, p["conv2_w"], p["conv2_b"])), 0.0)
    a = a.reshape(B, -1)
    a = jnp.maximum(jnp.dot(cast(a), cast(p["fc1_w"].T)) + p["fc1_b"], 0.0)
    logits = jnp.dot(cast(a), cast(p["fc2_w"].T)) + p["fc2_b"]
    out = {"logits": logits}
    if targets is not None:
        m = jnp.max(logits, axis=-1, keepdims=True)
        lse = m + jnp.log(jnp.sum(jnp.exp(logits - m), axis=-1, keepdims=True))
        tl = jnp.take_along_axis(logits, targets.astype(jnp.int32)[:, None], axis=-1)
        out["loss"] = jnp.mean(lse - tl)
    return out


if __name__ == "__main__":
    num_classes = 6
    B = 2
    key = jax.random.PRNGKey(0)
    kx, kt = jax.random.split(key)
    x = jax.random.normal(kx, (B, 8, 8), jnp.float32)       # fc1(256) => 8x8 input
    targets = jax.random.randint(kt, (B,), 0, num_classes).astype(jnp.int32)

    torch_params = init_params(num_classes)
    params = prepare_params(torch_params, compute_dtype=jnp.bfloat16)

    fwd = jax.jit(lambda xx, tt: cnn_forward(xx, params, tt))
    out = fwd(x, targets)
    logits = jax.block_until_ready(out["logits"])
    loss = jax.block_until_ready(out["loss"])
    assert logits.shape == (B, num_classes)
    assert loss.shape == ()

    # Layout / permutation correctness check against an independent reference.
    ref = reference_forward(x, torch_params, targets)
    np.testing.assert_allclose(np.asarray(logits), np.asarray(ref["logits"]),
                               rtol=1e-2, atol=1e-2)
    np.testing.assert_allclose(float(loss), float(ref["loss"]),
                               rtol=1e-2, atol=1e-2)
    print("KERNEL_OK")
</pallas_src>

<mosaic_0001>
module attributes {stable_mosaic.version = 11 : i64} {
  func.func @_fused_cnn_kernel(%arg0: i32, %arg1: memref<512x16xbf16, #tpu.memory_space<vmem>>, %arg2: memref<8x1xi32, #tpu.memory_space<vmem>>, %arg3: memref<16x64xbf16, #tpu.memory_space<vmem>>, %arg4: memref<1x64xf32, #tpu.memory_space<vmem>>, %arg5: memref<9x64x64xbf16, #tpu.memory_space<vmem>>, %arg6: memref<1x64xf32, #tpu.memory_space<vmem>>, %arg7: memref<256x128xbf16, #tpu.memory_space<vmem>>, %arg8: memref<1x128xf32, #tpu.memory_space<vmem>>, %arg9: memref<128x128xbf16, #tpu.memory_space<vmem>>, %arg10: memref<1x128xf32, #tpu.memory_space<vmem>>, %arg11: memref<8x128xf32, #tpu.memory_space<vmem>>, %arg12: memref<8x1xf32, #tpu.memory_space<vmem>>) attributes {dimension_semantics = [#tpu.dimension_semantics<parallel>], iteration_bounds = array<i64: 1>, scalar_prefetch = 0 : i64, scratch_operands = 0 : i64, tpu.core_type = #tpu.core_type<tc>, window_params = [{transform_indices = @transform_0, window_bounds = array<i64: 512, 16>}, {transform_indices = @transform_1, window_bounds = array<i64: 8, 1>}, {pipeline_mode = #tpu.pipeline_mode<synchronous>, transform_indices = @transform_2, window_bounds = array<i64: 16, 64>}, {pipeline_mode = #tpu.pipeline_mode<synchronous>, transform_indices = @transform_3, window_bounds = array<i64: 1, 64>}, {pipeline_mode = #tpu.pipeline_mode<synchronous>, transform_indices = @transform_4, window_bounds = array<i64: 9, 64, 64>}, {pipeline_mode = #tpu.pipeline_mode<synchronous>, transform_indices = @transform_5, window_bounds = array<i64: 1, 64>}, {pipeline_mode = #tpu.pipeline_mode<synchronous>, transform_indices = @transform_6, window_bounds = array<i64: 256, 128>}, {pipeline_mode = #tpu.pipeline_mode<synchronous>, transform_indices = @transform_7, window_bounds = array<i64: 1, 128>}, {pipeline_mode = #tpu.pipeline_mode<synchronous>, transform_indices = @transform_8, window_bounds = array<i64: 128, 128>}, {pipeline_mode = #tpu.pipeline_mode<synchronous>, transform_indices = @transform_9, window_bounds = array<i64: 1, 128>}, {transform_indices = @transform_10, window_bounds = array<i64: 8, 128>}, {transform_indices = @transform_11, window_bounds = array<i64: 8, 1>}]} {
    %c0 = arith.constant 0 : index
    %c0_0 = arith.constant 0 : index
    %0 = vector.load %arg1[%c0, %c0_0] : memref<512x16xbf16, #tpu.memory_space<vmem>>, vector<512x16xbf16>
    %c0_1 = arith.constant 0 : index
    %c0_2 = arith.constant 0 : index
    %1 = vector.load %arg3[%c0_1, %c0_2] : memref<16x64xbf16, #tpu.memory_space<vmem>>, vector<16x64xbf16>
    %cst = arith.constant dense<0.000000e+00> : vector<512x64xf32>
    %2 = tpu.matmul %0, %1, %cst {dimension_numbers = #tpu.dot_dimension_numbers<[1], [0], [0], [1], [0, 0, 1, 1], [], []>} : vector<512x16xbf16>, vector<16x64xbf16>, vector<512x64xf32> -> vector<512x64xf32>
    %c0_3 = arith.constant 0 : index
    %c0_4 = arith.constant 0 : index
    %3 = vector.load %arg4[%c0_3, %c0_4] : memref<1x64xf32, #tpu.memory_space<vmem>>, vector<1x64xf32>
    %4 = vector.broadcast %3 : vector<1x64xf32> to vector<512x64xf32>
    %5 = arith.addf %2, %4 : vector<512x64xf32>
    %6 = vector.extract_strided_slice %5 {offsets = [0, 0], sizes = [8, 64], strides = [1, 1]} : vector<512x64xf32> to vector<8x64xf32>
    %7 = vector.extract_strided_slice %5 {offsets = [8, 0], sizes = [8, 64], strides = [1, 1]} : vector<512x64xf32> to vector<8x64xf32>
    %8 = vector.extract_strided_slice %5 {offsets = [64, 0], sizes = [8, 64], strides = [1, 1]} : vector<512x64xf32> to vector<8x64xf32>
    %9 = vector.extract_strided_slice %5 {offsets = [72, 0], sizes = [8, 64], strides = [1, 1]} : vector<512x64xf32> to vector<8x64xf32>
    %10 = arith.maximumf %6, %7 : vector<8x64xf32>
    %11 = arith.maximumf %8, %9 : vector<8x64xf32>
    %12 = arith.maximumf %10, %11 : vector<8x64xf32>
    %cst_5 = arith.constant 0.000000e+00 : f32
    %13 = vector.broadcast %cst_5 : f32 to vector<8x64xf32>
    %14 = arith.maximumf %12, %13 : vector<8x64xf32>
    %15 = arith.truncf %14 : vector<8x64xf32> to vector<8x64xbf16>
    %16 = vector.extract_strided_slice %5 {offsets = [16, 0], sizes = [8, 64], strides = [1, 1]} : vector<512x64xf32> to vector<8x64xf32>
    %17 = vector.extract_strided_slice %5 {offsets = [24, 0], sizes = [8, 64], strides = [1, 1]} : vector<512x64xf32> to vector<8x64xf32>
    %18 = vector.extract_strided_slice %5 {offsets = [80, 0], sizes = [8, 64], strides = [1, 1]} : vector<512x64xf32> to vector<8x64xf32>
    %19 = vector.extract_strided_slice %5 {offsets = [88, 0], sizes = [8, 64], strides = [1, 1]} : vector<512x64xf32> to vector<8x64xf32>
    %20 = arith.maximumf %16, %17 : vector<8x64xf32>
    %21 = arith.maximumf %18, %19 : vector<8x64xf32>
    %22 = arith.maximumf %20, %21 : vector<8x64xf32>
    %cst_6 = arith.constant 0.000000e+00 : f32
    %23 = vector.broadcast %cst_6 : f32 to vector<8x64xf32>
    %24 = arith.maximumf %22, %23 : vector<8x64xf32>
    %25 = arith.truncf %24 : vector<8x64xf32> to vector<8x64xbf16>
    %26 = vector.extract_strided_slice %5 {offsets = [32, 0], sizes = [8, 64], strides = [1, 1]} : vector<512x64xf32> to vector<8x64xf32>
    %27 = vector.extract_strided_slice %5 {offsets = [40, 0], sizes = [8, 64], strides = [1, 1]} : vector<512x64xf32> to vector<8x64xf32>
    %28 = vector.extract_strided_slice %5 {offsets = [96, 0], sizes = [8, 64], strides = [1, 1]} : vector<512x64xf32> to vector<8x64xf32>
    %29 = vector.extract_strided_slice %5 {offsets = [104, 0], sizes = [8, 64], strides = [1, 1]} : vector<512x64xf32> to vector<8x64xf32>
    %30 = arith.maximumf %26, %27 : vector<8x64xf32>
    %31 = arith.maximumf %28, %29 : vector<8x64xf32>
    %32 = arith.maximumf %30, %31 : vector<8x64xf32>
    %cst_7 = arith.constant 0.000000e+00 : f32
    %33 = vector.broadcast %cst_7 : f32 to vector<8x64xf32>
    %34 = arith.maximumf %32, %33 : vector<8x64xf32>
    %35 = arith.truncf %34 : vector<8x64xf32> to vector<8x64xbf16>
    %36 = vector.extract_strided_slice %5 {offsets = [48, 0], sizes = [8, 64], strides = [1, 1]} : vector<512x64xf32> to vector<8x64xf32>
    %37 = vector.extract_strided_slice %5 {offsets = [56, 0], sizes = [8, 64], strides = [1, 1]} : vector<512x64xf32> to vector<8x64xf32>
    %38 = vector.extract_strided_slice %5 {offsets = [112, 0], sizes = [8, 64], strides = [1, 1]} : vector<512x64xf32> to vector<8x64xf32>
    %39 = vector.extract_strided_slice %5 {offsets = [120, 0], sizes = [8, 64], strides = [1, 1]} : vector<512x64xf32> to vector<8x64xf32>
    %40 = arith.maximumf %36, %37 : vector<8x64xf32>
    %41 = arith.maximumf %38, %39 : vector<8x64xf32>
    %42 = arith.maximumf %40, %41 : vector<8x64xf32>
    %cst_8 = arith.constant 0.000000e+00 : f32
    %43 = vector.broadcast %cst_8 : f32 to vector<8x64xf32>
    %44 = arith.maximumf %42, %43 : vector<8x64xf32>
    %45 = arith.truncf %44 : vector<8x64xf32> to vector<8x64xbf16>
    %46 = vector.extract_strided_slice %5 {offsets = [128, 0], sizes = [8, 64], strides = [1, 1]} : vector<512x64xf32> to vector<8x64xf32>
    %47 = vector.extract_strided_slice %5 {offsets = [136, 0], sizes = [8, 64], strides = [1, 1]} : vector<512x64xf32> to vector<8x64xf32>
    %48 = vector.extract_strided_slice %5 {offsets = [192, 0], sizes = [8, 64], strides = [1, 1]} : vector<512x64xf32> to vector<8x64xf32>
    %49 = vector.extract_strided_slice %5 {offsets = [200, 0], sizes = [8, 64], strides = [1, 1]} : vector<512x64xf32> to vector<8x64xf32>
    %50 = arith.maximumf %46, %47 : vector<8x64xf32>
    %51 = arith.maximumf %48, %49 : vector<8x64xf32>
    %52 = arith.maximumf %50, %51 : vector<8x64xf32>
    %cst_9 = arith.constant 0.000000e+00 : f32
    %53 = vector.broadcast %cst_9 : f32 to vector<8x64xf32>
    %54 = arith.maximumf %52, %53 : vector<8x64xf32>
    %55 = arith.truncf %54 : vector<8x64xf32> to vector<8x64xbf16>
    %56 = vector.extract_strided_slice %5 {offsets = [144, 0], sizes = [8, 64], strides = [1, 1]} : vector<512x64xf32> to vector<8x64xf32>
    %57 = vector.extract_strided_slice %5 {offsets = [152, 0], sizes = [8, 64], strides = [1, 1]} : vector<512x64xf32> to vector<8x64xf32>
    %58 = vector.extract_strided_slice %5 {offsets = [208, 0], sizes = [8, 64], strides = [1, 1]} : vector<512x64xf32> to vector<8x64xf32>
    %59 = vector.extract_strided_slice %5 {offsets = [216, 0], sizes = [8, 64], strides = [1, 1]} : vector<512x64xf32> to vector<8x64xf32>
    %60 = arith.maximumf %56, %57 : vector<8x64xf32>
    %61 = arith.maximumf %58, %59 : vector<8x64xf32>
    %62 = arith.maximumf %60, %61 : vector<8x64xf32>
    %cst_10 = arith.constant 0.000000e+00 : f32
    %63 = vector.broadcast %cst_10 : f32 to vector<8x64xf32>
    %64 = arith.maximumf %62, %63 : vector<8x64xf32>
    %65 = arith.truncf %64 : vector<8x64xf32> to vector<8x64xbf16>
    %66 = vector.extract_strided_slice %5 {offsets = [160, 0], sizes = [8, 64], strides = [1, 1]} : vector<512x64xf32> to vector<8x64xf32>
    %67 = vector.extract_strided_slice %5 {offsets = [168, 0], sizes = [8, 64], strides = [1, 1]} : vector<512x64xf32> to vector<8x64xf32>
    %68 = vector.extract_strided_slice %5 {offsets = [224, 0], sizes = [8, 64], strides = [1, 1]} : vector<512x64xf32> to vector<8x64xf32>
    %69 = vector.extract_strided_slice %5 {offsets = [232, 0], sizes = [8, 64], strides = [1, 1]} : vector<512x64xf32> to vector<8x64xf32>
    %70 = arith.maximumf %66, %67 : vector<8x64xf32>
    %71 = arith.maximumf %68, %69 : vector<8x64xf32>
    %72 = arith.maximumf %70, %71 : vector<8x64xf32>
    %cst_11 = arith.constant 0.000000e+00 : f32
    %73 = vector.broadcast %cst_11 : f32 to vector<8x64xf32>
    %74 = arith.maximumf %72, %73 : vector<8x64xf32>
    %75 = arith.truncf %74 : vector<8x64xf32> to vector<8x64xbf16>
    %76 = vector.extract_strided_slice %5 {offsets = [176, 0], sizes = [8, 64], strides = [1, 1]} : vector<512x64xf32> to vector<8x64xf32>
    %77 = vector.extract_strided_slice %5 {offsets = [184, 0], sizes = [8, 64], strides = [1, 1]} : vector<512x64xf32> to vector<8x64xf32>
    %78 = vector.extract_strided_slice %5 {offsets = [240, 0], sizes = [8, 64], strides = [1, 1]} : vector<512x64xf32> to vector<8x64xf32>
    %79 = vector.extract_strided_slice %5 {offsets = [248, 0], sizes = [8, 64], strides = [1, 1]} : vector<512x64xf32> to vector<8x64xf32>
    %80 = arith.maximumf %76, %77 : vector<8x64xf32>
    %81 = arith.maximumf %78, %79 : vector<8x64xf32>
    %82 = arith.maximumf %80, %81 : vector<8x64xf32>
    %cst_12 = arith.constant 0.000000e+00 : f32
    %83 = vector.broadcast %cst_12 : f32 to vector<8x64xf32>
    %84 = arith.maximumf %82, %83 : vector<8x64xf32>
    %85 = arith.truncf %84 : vector<8x64xf32> to vector<8x64xbf16>
    %86 = vector.extract_strided_slice %5 {offsets = [256, 0], sizes = [8, 64], strides = [1, 1]} : vector<512x64xf32> to vector<8x64xf32>
    %87 = vector.extract_strided_slice %5 {offsets = [264, 0], sizes = [8, 64], strides = [1, 1]} : vector<512x64xf32> to vector<8x64xf32>
    %88 = vector.extract_strided_slice %5 {offsets = [320, 0], sizes = [8, 64], strides = [1, 1]} : vector<512x64xf32> to vector<8x64xf32>
    %89 = vector.extract_strided_slice %5 {offsets = [328, 0], sizes = [8, 64], strides = [1, 1]} : vector<512x64xf32> to vector<8x64xf32>
    %90 = arith.maximumf %86, %87 : vector<8x64xf32>
    %91 = arith.maximumf %88, %89 : vector<8x64xf32>
    %92 = arith.maximumf %90, %91 : vector<8x64xf32>
    %cst_13 = arith.constant 0.000000e+00 : f32
    %93 = vector.broadcast %cst_13 : f32 to vector<8x64xf32>
    %94 = arith.maximumf %92, %93 : vector<8x64xf32>
    %95 = arith.truncf %94 : vector<8x64xf32> to vector<8x64xbf16>
    %96 = vector.extract_strided_slice %5 {offsets = [272, 0], sizes = [8, 64], strides = [1, 1]} : vector<512x64xf32> to vector<8x64xf32>
    %97 = vector.extract_strided_slice %5 {offsets = [280, 0], sizes = [8, 64], strides = [1, 1]} : vector<512x64xf32> to vector<8x64xf32>
    %98 = vector.extract_strided_slice %5 {offsets = [336, 0], sizes = [8, 64], strides = [1, 1]} : vector<512x64xf32> to vector<8x64xf32>
    %99 = vector.extract_strided_slice %5 {offsets = [344, 0], sizes = [8, 64], strides = [1, 1]} : vector<512x64xf32> to vector<8x64xf32>
    %100 = arith.maximumf %96, %97 : vector<8x64xf32>
    %101 = arith.maximumf %98, %99 : vector<8x64xf32>
    %102 = arith.maximumf %100, %101 : vector<8x64xf32>
    %cst_14 = arith.constant 0.000000e+00 : f32
    %103 = vector.broadcast %cst_14 : f32 to vector<8x64xf32>
    %104 = arith.maximumf %102, %103 : vector<8x64xf32>
    %105 = arith.truncf %104 : vector<8x64xf32> to vector<8x64xbf16>
    %106 = vector.extract_strided_slice %5 {offsets = [288, 0], sizes = [8, 64], strides = [1, 1]} : vector<512x64xf32> to vector<8x64xf32>
    %107 = vector.extract_strided_slice %5 {offsets = [296, 0], sizes = [8, 64], strides = [1, 1]} : vector<512x64xf32> to vector<8x64xf32>
    %108 = vector.extract_strided_slice %5 {offsets = [352, 0], sizes = [8, 64], strides = [1, 1]} : vector<512x64xf32> to vector<8x64xf32>
    %109 = vector.extract_strided_slice %5 {offsets = [360, 0], sizes = [8, 64], strides = [1, 1]} : vector<512x64xf32> to vector<8x64xf32>
    %110 = arith.maximumf %106, %107 : vector<8x64xf32>
    %111 = arith.maximumf %108, %109 : vector<8x64xf32>
    %112 = arith.maximumf %110, %111 : vector<8x64xf32>
    %cst_15 = arith.constant 0.000000e+00 : f32
    %113 = vector.broadcast %cst_15 : f32 to vector<8x64xf32>
    %114 = arith.maximumf %112, %113 : vector<8x64xf32>
    %115 = arith.truncf %114 : vector<8x64xf32> to vector<8x64xbf16>
    %116 = vector.extract_strided_slice %5 {offsets = [304, 0], sizes = [8, 64], strides = [1, 1]} : vector<512x64xf32> to vector<8x64xf32>
    %117 = vector.extract_strided_slice %5 {offsets = [312, 0], sizes = [8, 64], strides = [1, 1]} : vector<512x64xf32> to vector<8x64xf32>
    %118 = vector.extract_strided_slice %5 {offsets = [368, 0], sizes = [8, 64], strides = [1, 1]} : vector<512x64xf32> to vector<8x64xf32>
    %119 = vector.extract_strided_slice %5 {offsets = [376, 0], sizes = [8, 64], strides = [1, 1]} : vector<512x64xf32> to vector<8x64xf32>
    %120 = arith.maximumf %116, %117 : vector<8x64xf32>
    %121 = arith.maximumf %118, %119 : vector<8x64xf32>
    %122 = arith.maximumf %120, %121 : vector<8x64xf32>
    %cst_16 = arith.constant 0.000000e+00 : f32
    %123 = vector.broadcast %cst_16 : f32 to vector<8x64xf32>
    %124 = arith.maximumf %122, %123 : vector<8x64xf32>
    %125 = arith.truncf %124 : vector<8x64xf32> to vector<8x64xbf16>
    %126 = vector.extract_strided_slice %5 {offsets = [384, 0], sizes = [8, 64], strides = [1, 1]} : vector<512x64xf32> to vector<8x64xf32>
    %127 = vector.extract_strided_slice %5 {offsets = [392, 0], sizes = [8, 64], strides = [1, 1]} : vector<512x64xf32> to vector<8x64xf32>
    %128 = vector.extract_strided_slice %5 {offsets = [448, 0], sizes = [8, 64], strides = [1, 1]} : vector<512x64xf32> to vector<8x64xf32>
    %129 = vector.extract_strided_slice %5 {offsets = [456, 0], sizes = [8, 64], strides = [1, 1]} : vector<512x64xf32> to vector<8x64xf32>
    %130 = arith.maximumf %126, %127 : vector<8x64xf32>
    %131 = arith.maximumf %128, %129 : vector<8x64xf32>
    %132 = arith.maximumf %130, %131 : vector<8x64xf32>
    %cst_17 = arith.constant 0.000000e+00 : f32
    %133 = vector.broadcast %cst_17 : f32 to vector<8x64xf32>
    %134 = arith.maximumf %132, %133 : vector<8x64xf32>
    %135 = arith.truncf %134 : vector<8x64xf32> to vector<8x64xbf16>
    %136 = vector.extract_strided_slice %5 {offsets = [400, 0], sizes = [8, 64], strides = [1, 1]} : vector<512x64xf32> to vector<8x64xf32>
    %137 = vector.extract_strided_slice %5 {offsets = [408, 0], sizes = [8, 64], strides = [1, 1]} : vector<512x64xf32> to vector<8x64xf32>
    %138 = vector.extract_strided_slice %5 {offsets = [464, 0], sizes = [8, 64], strides = [1, 1]} : vector<512x64xf32> to vector<8x64xf32>
    %139 = vector.extract_strided_slice %5 {offsets = [472, 0], sizes = [8, 64], strides = [1, 1]} : vector<512x64xf32> to vector<8x64xf32>
    %140 = arith.maximumf %136, %137 : vector<8x64xf32>
    %141 = arith.maximumf %138, %139 : vector<8x64xf32>
    %142 = arith.maximumf %140, %141 : vector<8x64xf32>
    %cst_18 = arith.constant 0.000000e+00 : f32
    %143 = vector.broadcast %cst_18 : f32 to vector<8x64xf32>
    %144 = arith.maximumf %142, %143 : vector<8x64xf32>
    %145 = arith.truncf %144 : vector<8x64xf32> to vector<8x64xbf16>
    %146 = vector.extract_strided_slice %5 {offsets = [416, 0], sizes = [8, 64], strides = [1, 1]} : vector<512x64xf32> to vector<8x64xf32>
    %147 = vector.extract_strided_slice %5 {offsets = [424, 0], sizes = [8, 64], strides = [1, 1]} : vector<512x64xf32> to vector<8x64xf32>
    %148 = vector.extract_strided_slice %5 {offsets = [480, 0], sizes = [8, 64], strides = [1, 1]} : vector<512x64xf32> to vector<8x64xf32>
    %149 = vector.extract_strided_slice %5 {offsets = [488, 0], sizes = [8, 64], strides = [1, 1]} : vector<512x64xf32> to vector<8x64xf32>
    %150 = arith.maximumf %146, %147 : vector<8x64xf32>
    %151 = arith.maximumf %148, %149 : vector<8x64xf32>
    %152 = arith.maximumf %150, %151 : vector<8x64xf32>
    %cst_19 = arith.constant 0.000000e+00 : f32
    %153 = vector.broadcast %cst_19 : f32 to vector<8x64xf32>
    %154 = arith.maximumf %152, %153 : vector<8x64xf32>
    %155 = arith.truncf %154 : vector<8x64xf32> to vector<8x64xbf16>
    %156 = vector.extract_strided_slice %5 {offsets = [432, 0], sizes = [8, 64], strides = [1, 1]} : vector<512x64xf32> to vector<8x64xf32>
    %157 = vector.extract_strided_slice %5 {offsets = [440, 0], sizes = [8, 64], strides = [1, 1]} : vector<512x64xf32> to vector<8x64xf32>
    %158 = vector.extract_strided_slice %5 {offsets = [496, 0], sizes = [8, 64], strides = [1, 1]} : vector<512x64xf32> to vector<8x64xf32>
    %159 = vector.extract_strided_slice %5 {offsets = [504, 0], sizes = [8, 64], strides = [1, 1]} : vector<512x64xf32> to vector<8x64xf32>
    %160 = arith.maximumf %156, %157 : vector<8x64xf32>
    %161 = arith.maximumf %158, %159 : vector<8x64xf32>
    %162 = arith.maximumf %160, %161 : vector<8x64xf32>
    %cst_20 = arith.constant 0.000000e+00 : f32
    %163 = vector.broadcast %cst_20 : f32 to vector<8x64xf32>
    %164 = arith.maximumf %162, %163 : vector<8x64xf32>
    %165 = arith.truncf %164 : vector<8x64xf32> to vector<8x64xbf16>
    %cst_21 = arith.constant 0.000000e+00 : bf16
    %166 = vector.broadcast %cst_21 : bf16 to vector<8x64xbf16>
    %167 = tpu.concatenate %166, %166, %166, %166, %166, %15, %25, %35, %166, %55, %65, %75, %166, %95, %105, %115 in 0 : vector<8x64xbf16>, vector<8x64xbf16>, vector<8x64xbf16>, vector<8x64xbf16>, vector<8x64xbf16>, vector<8x64xbf16>, vector<8x64xbf16>, vector<8x64xbf16>, vector<8x64xbf16>, vector<8x64xbf16>, vector<8x64xbf16>, vector<8x64xbf16>, vector<8x64xbf16>, vector<8x64xbf16>, vector<8x64xbf16>, vector<8x64xbf16> -> vector<128x64xbf16>
    %c0_22 = arith.constant 0 : index
    %c0_23 = arith.constant 0 : index
    %c0_24 = arith.constant 0 : index
    %168 = vector.load %arg5[%c0_22, %c0_23, %c0_24] : memref<9x64x64xbf16, #tpu.memory_space<vmem>>, vector<1x64x64xbf16>
    %169 = vector.shape_cast %168 : vector<1x64x64xbf16> to vector<64x64xbf16>
    %cst_25 = arith.constant dense<0.000000e+00> : vector<128x64xf32>
    %170 = tpu.matmul %167, %169, %cst_25 {dimension_numbers = #tpu.dot_dimension_numbers<[1], [0], [0], [1], [0, 0, 1, 1], [], []>} : vector<128x64xbf16>, vector<64x64xbf16>, vector<128x64xf32> -> vector<128x64xf32>
    %171 = tpu.concatenate %166, %166, %166, %166, %15, %25, %35, %45, %55, %65, %75, %85, %95, %105, %115, %125 in 0 : vector<8x64xbf16>, vector<8x64xbf16>, vector<8x64xbf16>, vector<8x64xbf16>, vector<8x64xbf16>, vector<8x64xbf16>, vector<8x64xbf16>, vector<8x64xbf16>, vector<8x64xbf16>, vector<8x64xbf16>, vector<8x64xbf16>, vector<8x64xbf16>, vector<8x64xbf16>, vector<8x64xbf16>, vector<8x64xbf16>, vector<8x64xbf16> -> vector<128x64xbf16>
    %c1 = arith.constant 1 : index
    %c0_26 = arith.constant 0 : index
    %c0_27 = arith.constant 0 : index
    %172 = vector.load %arg5[%c1, %c0_26, %c0_27] : memref<9x64x64xbf16, #tpu.memory_space<vmem>>, vector<1x64x64xbf16>
    %173 = vector.shape_cast %172 : vector<1x64x64xbf16> to vector<64x64xbf16>
    %cst_28 = arith.constant dense<0.000000e+00> : vector<128x64xf32>
    %174 = tpu.matmul %171, %173, %cst_28 {dimension_numbers = #tpu.dot_dimension_numbers<[1], [0], [0], [1], [0, 0, 1, 1], [], []>} : vector<128x64xbf16>, vector<64x64xbf16>, vector<128x64xf32> -> vector<128x64xf32>
    %175 = arith.addf %170, %174 : vector<128x64xf32>
    %176 = tpu.concatenate %166, %166, %166, %166, %25, %35, %45, %166, %65, %75, %85, %166, %105, %115, %125, %166 in 0 : vector<8x64xbf16>, vector<8x64xbf16>, vector<8x64xbf16>, vector<8x64xbf16>, vector<8x64xbf16>, vector<8x64xbf16>, vector<8x64xbf16>, vector<8x64xbf16>, vector<8x64xbf16>, vector<8x64xbf16>, vector<8x64xbf16>, vector<8x64xbf16>, vector<8x64xbf16>, vector<8x64xbf16>, vector<8x64xbf16>, vector<8x64xbf16> -> vector<128x64xbf16>
    %c2 = arith.constant 2 : index
    %c0_29 = arith.constant 0 : index
    %c0_30 = arith.constant 0 : index
    %177 = vector.load %arg5[%c2, %c0_29, %c0_30] : memref<9x64x64xbf16, #tpu.memory_space<vmem>>, vector<1x64x64xbf16>
    %178 = vector.shape_cast %177 : vector<1x64x64xbf16> to vector<64x64xbf16>
    %cst_31 = arith.constant dense<0.000000e+00> : vector<128x64xf32>
    %179 = tpu.matmul %176, %178, %cst_31 {dimension_numbers = #tpu.dot_dimension_numbers<[1], [0], [0], [1], [0, 0, 1, 1], [], []>} : vector<128x64xbf16>, vector<64x64xbf16>, vector<128x64xf32> -> vector<128x64xf32>
    %180 = arith.addf %175, %179 : vector<128x64xf32>
    %181 = tpu.concatenate %166, %15, %25, %35, %166, %55, %65, %75, %166, %95, %105, %115, %166, %135, %145, %155 in 0 : vector<8x64xbf16>, vector<8x64xbf16>, vector<8x64xbf16>, vector<8x64xbf16>, vector<8x64xbf16>, vector<8x64xbf16>, vector<8x64xbf16>, vector<8x64xbf16>, vector<8x64xbf16>, vector<8x64xbf16>, vector<8x64xbf16>, vector<8x64xbf16>, vector<8x64xbf16>, vector<8x64xbf16>, vector<8x64xbf16>, vector<8x64xbf16> -> vector<128x64xbf16>
    %c3 = arith.constant 3 : index
    %c0_32 = arith.constant 0 : index
    %c0_33 = arith.constant 0 : index
    %182 = vector.load %arg5[%c3, %c0_32, %c0_33] : memref<9x64x64xbf16, #tpu.memory_space<vmem>>, vector<1x64x64xbf16>
    %183 = vector.shape_cast %182 : vector<1x64x64xbf16> to vector<64x64xbf16>
    %cst_34 = arith.constant dense<0.000000e+00> : vector<128x64xf32>
    %184 = tpu.matmul %181, %183, %cst_34 {dimension_numbers = #tpu.dot_dimension_numbers<[1], [0], [0], [1], [0, 0, 1, 1], [], []>} : vector<128x64xbf16>, vector<64x64xbf16>, vector<128x64xf32> -> vector<128x64xf32>
    %185 = arith.addf %180, %184 : vector<128x64xf32>
    %186 = tpu.concatenate %15, %25, %35, %45, %55, %65, %75, %85, %95, %105, %115, %125, %135, %145, %155, %165 in 0 : vector<8x64xbf16>, vector<8x64xbf16>, vector<8x64xbf16>, vector<8x64xbf16>, vector<8x64xbf16>, vector<8x64xbf16>, vector<8x64xbf16>, vector<8x64xbf16>, vector<8x64xbf16>, vector<8x64xbf16>, vector<8x64xbf16>, vector<8x64xbf16>, vector<8x64xbf16>, vector<8x64xbf16>, vector<8x64xbf16>, vector<8x64xbf16> -> vector<128x64xbf16>
    %c4 = arith.constant 4 : index
    %c0_35 = arith.constant 0 : index
    %c0_36 = arith.constant 0 : index
    %187 = vector.load %arg5[%c4, %c0_35, %c0_36] : memref<9x64x64xbf16, #tpu.memory_space<vmem>>, vector<1x64x64xbf16>
    %188 = vector.shape_cast %187 : vector<1x64x64xbf16> to vector<64x64xbf16>
    %cst_37 = arith.constant dense<0.000000e+00> : vector<128x64xf32>
    %189 = tpu.matmul %186, %188, %cst_37 {dimension_numbers = #tpu.dot_dimension_numbers<[1], [0], [0], [1], [0, 0, 1, 1], [], []>} : vector<128x64xbf16>, vector<64x64xbf16>, vector<128x64xf32> -> vector<128x64xf32>
    %190 = arith.addf %185, %189 : vector<128x64xf32>
    %191 = tpu.concatenate %25, %35, %45, %166, %65, %75, %85, %166, %105, %115, %125, %166, %145, %155, %165, %166 in 0 : vector<8x64xbf16>, vector<8x64xbf16>, vector<8x64xbf16>, vector<8x64xbf16>, vector<8x64xbf16>, vector<8x64xbf16>, vector<8x64xbf16>, vector<8x64xbf16>, vector<8x64xbf16>, vector<8x64xbf16>, vector<8x64xbf16>, vector<8x64xbf16>, vector<8x64xbf16>, vector<8x64xbf16>, vector<8x64xbf16>, vector<8x64xbf16> -> vector<128x64xbf16>
    %c5 = arith.constant 5 : index
    %c0_38 = arith.constant 0 : index
    %c0_39 = arith.constant 0 : index
    %192 = vector.load %arg5[%c5, %c0_38, %c0_39] : memref<9x64x64xbf16, #tpu.memory_space<vmem>>, vector<1x64x64xbf16>
    %193 = vector.shape_cast %192 : vector<1x64x64xbf16> to vector<64x64xbf16>
    %cst_40 = arith.constant dense<0.000000e+00> : vector<128x64xf32>
    %194 = tpu.matmul %191, %193, %cst_40 {dimension_numbers = #tpu.dot_dimension_numbers<[1], [0], [0], [1], [0, 0, 1, 1], [], []>} : vector<128x64xbf16>, vector<64x64xbf16>, vector<128x64xf32> -> vector<128x64xf32>
    %195 = arith.addf %190, %194 : vector<128x64xf32>
    %196 = tpu.concatenate %166, %55, %65, %75, %166, %95, %105, %115, %166, %135, %145, %155, %166, %166, %166, %166 in 0 : vector<8x64xbf16>, vector<8x64xbf16>, vector<8x64xbf16>, vector<8x64xbf16>, vector<8x64xbf16>, vector<8x64xbf16>, vector<8x64xbf16>, vector<8x64xbf16>, vector<8x64xbf16>, vector<8x64xbf16>, vector<8x64xbf16>, vector<8x64xbf16>, vector<8x64xbf16>, vector<8x64xbf16>, vector<8x64xbf16>, vector<8x64xbf16> -> vector<128x64xbf16>
    %c6 = arith.constant 6 : index
    %c0_41 = arith.constant 0 : index
    %c0_42 = arith.constant 0 : index
    %197 = vector.load %arg5[%c6, %c0_41, %c0_42] : memref<9x64x64xbf16, #tpu.memory_space<vmem>>, vector<1x64x64xbf16>
    %198 = vector.shape_cast %197 : vector<1x64x64xbf16> to vector<64x64xbf16>
    %cst_43 = arith.constant dense<0.000000e+00> : vector<128x64xf32>
    %199 = tpu.matmul %196, %198, %cst_43 {dimension_numbers = #tpu.dot_dimension_numbers<[1], [0], [0], [1], [0, 0, 1, 1], [], []>} : vector<128x64xbf16>, vector<64x64xbf16>, vector<128x64xf32> -> vector<128x64xf32>
    %200 = arith.addf %195, %199 : vector<128x64xf32>
    %201 = tpu.concatenate %55, %65, %75, %85, %95, %105, %115, %125, %135, %145, %155, %165, %166, %166, %166, %166 in 0 : vector<8x64xbf16>, vector<8x64xbf16>, vector<8x64xbf16>, vector<8x64xbf16>, vector<8x64xbf16>, vector<8x64xbf16>, vector<8x64xbf16>, vector<8x64xbf16>, vector<8x64xbf16>, vector<8x64xbf16>, vector<8x64xbf16>, vector<8x64xbf16>, vector<8x64xbf16>, vector<8x64xbf16>, vector<8x64xbf16>, vector<8x64xbf16> -> vector<128x64xbf16>
    %c7 = arith.constant 7 : index
    %c0_44 = arith.constant 0 : index
    %c0_45 = arith.constant 0 : index
    %202 = vector.load %arg5[%c7, %c0_44, %c0_45] : memref<9x64x64xbf16, #tpu.memory_space<vmem>>, vector<1x64x64xbf16>
    %203 = vector.shape_cast %202 : vector<1x64x64xbf16> to vector<64x64xbf16>
    %cst_46 = arith.constant dense<0.000000e+00> : vector<128x64xf32>
    %204 = tpu.matmul %201, %203, %cst_46 {dimension_numbers = #tpu.dot_dimension_numbers<[1], [0], [0], [1], [0, 0, 1, 1], [], []>} : vector<128x64xbf16>, vector<64x64xbf16>, vector<128x64xf32> -> vector<128x64xf32>
    %205 = arith.addf %200, %204 : vector<128x64xf32>
    %206 = tpu.concatenate %65, %75, %85, %166, %105, %115, %125, %166, %145, %155, %165, %166, %166, %166, %166, %166 in 0 : vector<8x64xbf16>, vector<8x64xbf16>, vector<8x64xbf16>, vector<8x64xbf16>, vector<8x64xbf16>, vector<8x64xbf16>, vector<8x64xbf16>, vector<8x64xbf16>, vector<8x64xbf16>, vector<8x64xbf16>, vector<8x64xbf16>, vector<8x64xbf16>, vector<8x64xbf16>, vector<8x64xbf16>, vector<8x64xbf16>, vector<8x64xbf16> -> vector<128x64xbf16>
    %c8 = arith.constant 8 : index
    %c0_47 = arith.constant 0 : index
    %c0_48 = arith.constant 0 : index
    %207 = vector.load %arg5[%c8, %c0_47, %c0_48] : memref<9x64x64xbf16, #tpu.memory_space<vmem>>, vector<1x64x64xbf16>
    %208 = vector.shape_cast %207 : vector<1x64x64xbf16> to vector<64x64xbf16>
    %cst_49 = arith.constant dense<0.000000e+00> : vector<128x64xf32>
    %209 = tpu.matmul %206, %208, %cst_49 {dimension_numbers = #tpu.dot_dimension_numbers<[1], [0], [0], [1], [0, 0, 1, 1], [], []>} : vector<128x64xbf16>, vector<64x64xbf16>, vector<128x64xf32> -> vector<128x64xf32>
    %210 = arith.addf %205, %209 : vector<128x64xf32>
    %c0_50 = arith.constant 0 : index
    %c0_51 = arith.constant 0 : index
    %211 = vector.load %arg6[%c0_50, %c0_51] : memref<1x64xf32, #tpu.memory_space<vmem>>, vector<1x64xf32>
    %212 = vector.broadcast %211 : vector<1x64xf32> to vector<128x64xf32>
    %213 = arith.addf %210, %212 : vector<128x64xf32>
    %214 = vector.extract_strided_slice %213 {offsets = [0, 0], sizes = [8, 64], strides = [1, 1]} : vector<128x64xf32> to vector<8x64xf32>
    %215 = vector.extract_strided_slice %213 {offsets = [8, 0], sizes = [8, 64], strides = [1, 1]} : vector<128x64xf32> to vector<8x64xf32>
    %216 = vector.extract_strided_slice %213 {offsets = [32, 0], sizes = [8, 64], strides = [1, 1]} : vector<128x64xf32> to vector<8x64xf32>
    %217 = vector.extract_strided_slice %213 {offsets = [40, 0], sizes = [8, 64], strides = [1, 1]} : vector<128x64xf32> to vector<8x64xf32>
    %218 = arith.maximumf %214, %215 : vector<8x64xf32>
    %219 = arith.maximumf %216, %217 : vector<8x64xf32>
    %220 = arith.maximumf %218, %219 : vector<8x64xf32>
    %cst_52 = arith.constant 0.000000e+00 : f32
    %221 = vector.broadcast %cst_52 : f32 to vector<8x64xf32>
    %222 = arith.maximumf %220, %221 : vector<8x64xf32>
    %223 = arith.truncf %222 : vector<8x64xf32> to vector<8x64xbf16>
    %224 = vector.extract_strided_slice %213 {offsets = [16, 0], sizes = [8, 64], strides = [1, 1]} : vector<128x64xf32> to vector<8x64xf32>
    %225 = vector.extract_strided_slice %213 {offsets = [24, 0], sizes = [8, 64], strides = [1, 1]} : vector<128x64xf32> to vector<8x64xf32>
    %226 = vector.extract_strided_slice %213 {offsets = [48, 0], sizes = [8, 64], strides = [1, 1]} : vector<128x64xf32> to vector<8x64xf32>
    %227 = vector.extract_strided_slice %213 {offsets = [56, 0], sizes = [8, 64], strides = [1, 1]} : vector<128x64xf32> to vector<8x64xf32>
    %228 = arith.maximumf %224, %225 : vector<8x64xf32>
    %229 = arith.maximumf %226, %227 : vector<8x64xf32>
    %230 = arith.maximumf %228, %229 : vector<8x64xf32>
    %cst_53 = arith.constant 0.000000e+00 : f32
    %231 = vector.broadcast %cst_53 : f32 to vector<8x64xf32>
    %232 = arith.maximumf %230, %231 : vector<8x64xf32>
    %233 = arith.truncf %232 : vector<8x64xf32> to vector<8x64xbf16>
    %234 = vector.extract_strided_slice %213 {offsets = [64, 0], sizes = [8, 64], strides = [1, 1]} : vector<128x64xf32> to vector<8x64xf32>
    %235 = vector.extract_strided_slice %213 {offsets = [72, 0], sizes = [8, 64], strides = [1, 1]} : vector<128x64xf32> to vector<8x64xf32>
    %236 = vector.extract_strided_slice %213 {offsets = [96, 0], sizes = [8, 64], strides = [1, 1]} : vector<128x64xf32> to vector<8x64xf32>
    %237 = vector.extract_strided_slice %213 {offsets = [104, 0], sizes = [8, 64], strides = [1, 1]} : vector<128x64xf32> to vector<8x64xf32>
    %238 = arith.maximumf %234, %235 : vector<8x64xf32>
    %239 = arith.maximumf %236, %237 : vector<8x64xf32>
    %240 = arith.maximumf %238, %239 : vector<8x64xf32>
    %cst_54 = arith.constant 0.000000e+00 : f32
    %241 = vector.broadcast %cst_54 : f32 to vector<8x64xf32>
    %242 = arith.maximumf %240, %241 : vector<8x64xf32>
    %243 = arith.truncf %242 : vector<8x64xf32> to vector<8x64xbf16>
    %244 = vector.extract_strided_slice %213 {offsets = [80, 0], sizes = [8, 64], strides = [1, 1]} : vector<128x64xf32> to vector<8x64xf32>
    %245 = vector.extract_strided_slice %213 {offsets = [88, 0], sizes = [8, 64], strides = [1, 1]} : vector<128x64xf32> to vector<8x64xf32>
    %246 = vector.extract_strided_slice %213 {offsets = [112, 0], sizes = [8, 64], strides = [1, 1]} : vector<128x64xf32> to vector<8x64xf32>
    %247 = vector.extract_strided_slice %213 {offsets = [120, 0], sizes = [8, 64], strides = [1, 1]} : vector<128x64xf32> to vector<8x64xf32>
    %248 = arith.maximumf %244, %245 : vector<8x64xf32>
    %249 = arith.maximumf %246, %247 : vector<8x64xf32>
    %250 = arith.maximumf %248, %249 : vector<8x64xf32>
    %cst_55 = arith.constant 0.000000e+00 : f32
    %251 = vector.broadcast %cst_55 : f32 to vector<8x64xf32>
    %252 = arith.maximumf %250, %251 : vector<8x64xf32>
    %253 = arith.truncf %252 : vector<8x64xf32> to vector<8x64xbf16>
    %254 = tpu.concatenate %223, %233, %243, %253 in 1 : vector<8x64xbf16>, vector<8x64xbf16>, vector<8x64xbf16>, vector<8x64xbf16> -> vector<8x256xbf16>
    %c0_56 = arith.constant 0 : index
    %c0_57 = arith.constant 0 : index
    %255 = vector.load %arg7[%c0_56, %c0_57] : memref<256x128xbf16, #tpu.memory_space<vmem>>, vector<256x128xbf16>
    %cst_58 = arith.constant dense<0.000000e+00> : vector<8x128xf32>
    %256 = tpu.matmul %254, %255, %cst_58 {dimension_numbers = #tpu.dot_dimension_numbers<[1], [0], [0], [1], [0, 0, 1, 1], [], []>} : vector<8x256xbf16>, vector<256x128xbf16>, vector<8x128xf32> -> vector<8x128xf32>
    %c0_59 = arith.constant 0 : index
    %c0_60 = arith.constant 0 : index
    %257 = vector.load %arg8[%c0_59, %c0_60] : memref<1x128xf32, #tpu.memory_space<vmem>>, vector<1x128xf32>
    %258 = vector.broadcast %257 : vector<1x128xf32> to vector<8x128xf32>
    %259 = arith.addf %256, %258 : vector<8x128xf32>
    %cst_61 = arith.constant 0.000000e+00 : f32
    %260 = vector.broadcast %cst_61 : f32 to vector<8x128xf32>
    %261 = arith.maximumf %259, %260 : vector<8x128xf32>
    %262 = arith.truncf %261 : vector<8x128xf32> to vector<8x128xbf16>
    %c0_62 = arith.constant 0 : index
    %c0_63 = arith.constant 0 : index
    %263 = vector.load %arg9[%c0_62, %c0_63] : memref<128x128xbf16, #tpu.memory_space<vmem>>, vector<128x128xbf16>
    %cst_64 = arith.constant dense<0.000000e+00> : vector<8x128xf32>
    %264 = tpu.matmul %262, %263, %cst_64 {dimension_numbers = #tpu.dot_dimension_numbers<[1], [0], [0], [1], [0, 0, 1, 1], [], []>} : vector<8x128xbf16>, vector<128x128xbf16>, vector<8x128xf32> -> vector<8x128xf32>
    %c0_65 = arith.constant 0 : index
    %c0_66 = arith.constant 0 : index
    %265 = vector.load %arg10[%c0_65, %c0_66] : memref<1x128xf32, #tpu.memory_space<vmem>>, vector<1x128xf32>
    %266 = vector.broadcast %265 : vector<1x128xf32> to vector<8x128xf32>
    %267 = arith.addf %264, %266 : vector<8x128xf32>
    %c0_67 = arith.constant 0 : index
    %c0_68 = arith.constant 0 : index
    %268 = vector.load %arg11[%c0_67, %c0_68] : memref<8x128xf32, #tpu.memory_space<vmem>>, vector<8x128xf32>
    tpu.vector_store %arg11[%c0_67, %c0_68], %267 {strides = array<i32>} : memref<8x128xf32, #tpu.memory_space<vmem>>, vector<8x128xf32>,
    %cst_69 = arith.constant dense<0xFF800000> : vector<8xf32>
    %269 = vector.multi_reduction <maximumf>, %267, %cst_69 [1] : vector<8x128xf32> to vector<8xf32>
    %270 = vector.shape_cast %269 : vector<8xf32> to vector<8x1xf32>
    %271 = vector.broadcast %270 : vector<8x1xf32> to vector<8x128xf32>
    %272 = arith.subf %267, %271 : vector<8x128xf32>
    %273 = math.exp %272 : vector<8x128xf32>
    %cst_70 = arith.constant dense<0.000000e+00> : vector<8xf32>
    %274 = vector.multi_reduction <add>, %273, %cst_70 [1] : vector<8x128xf32> to vector<8xf32>
    %275 = vector.shape_cast %274 : vector<8xf32> to vector<8x1xf32>
    %276 = math.log %275 : vector<8x1xf32>
    %277 = arith.addf %270, %276 : vector<8x1xf32>
    %c0_71 = arith.constant 0 : index
    %c0_72 = arith.constant 0 : index
    %278 = vector.load %arg2[%c0_71, %c0_72] : memref<8x1xi32, #tpu.memory_space<vmem>>, vector<8x1xi32>
    %279 = tpu.iota {dimensions = array<i32: 1>} : vector<8x128xi32>
    %280 = vector.broadcast %278 : vector<8x1xi32> to vector<8x128xi32>
    %281 = arith.cmpi eq, %279, %280 : vector<8x128xi32>
    %cst_73 = arith.constant 0.000000e+00 : f32
    %282 = vector.broadcast %cst_73 : f32 to vector<8x128xf32>
    %283 = arith.select %281, %267, %282 : vector<8x128xi1>, vector<8x128xf32>
    %cst_74 = arith.constant dense<0.000000e+00> : vector<8xf32>
    %284 = vector.multi_reduction <add>, %283, %cst_74 [1] : vector<8x128xf32> to vector<8xf32>
    %285 = vector.shape_cast %284 : vector<8xf32> to vector<8x1xf32>
    %c0_i32 = arith.constant 0 : i32
    %286 = vector.broadcast %c0_i32 : i32 to vector<8x1xi32>
    %287 = arith.cmpi sge, %278, %286 : vector<8x1xi32>
    %288 = arith.extui %287 : vector<8x1xi1> to vector<8x1xi32>
    %289 = arith.sitofp %288 : vector<8x1xi32> to vector<8x1xf32>
    %290 = arith.subf %277, %285 : vector<8x1xf32>
    %291 = arith.mulf %290, %289 : vector<8x1xf32>
    %c0_75 = arith.constant 0 : index
    %c0_76 = arith.constant 0 : index
    %292 = vector.load %arg12[%c0_75, %c0_76] : memref<8x1xf32, #tpu.memory_space<vmem>>, vector<8x1xf32>
    tpu.vector_store %arg12[%c0_75, %c0_76], %291 {strides = array<i32>} : memref<8x1xf32, #tpu.memory_space<vmem>>, vector<8x1xf32>,
    return
  }
  func.func @transform_0(%arg0: i32) -> (i32, i32) {
    %c0_i32 = arith.constant 0 : i32
    %c0_i32_0 = arith.constant 0 : i32
    return %arg0, %c0_i32 : i32, i32
  }
  func.func @transform_1(%arg0: i32) -> (i32, i32) {
    %c0_i32 = arith.constant 0 : i32
    %c0_i32_0 = arith.constant 0 : i32
    return %arg0, %c0_i32 : i32, i32
  }
  func.func @transform_2(%arg0: i32) -> (i32, i32) {
    %c0_i32 = arith.constant 0 : i32
    %c0_i32_0 = arith.constant 0 : i32
    %c0_i32_1 = arith.constant 0 : i32
    return %c0_i32, %c0_i32_0 : i32, i32
  }
  func.func @transform_3(%arg0: i32) -> (i32, i32) {
    %c0_i32 = arith.constant 0 : i32
    %c0_i32_0 = arith.constant 0 : i32
    %c0_i32_1 = arith.constant 0 : i32
    return %c0_i32, %c0_i32_0 : i32, i32
  }
  func.func @transform_4(%arg0: i32) -> (i32, i32, i32) {
    %c0_i32 = arith.constant 0 : i32
    %c0_i32_0 = arith.constant 0 : i32
    %c0_i32_1 = arith.constant 0 : i32
    %c0_i32_2 = arith.constant 0 : i32
    return %c0_i32, %c0_i32_0, %c0_i32_1 : i32, i32, i32
  }
  func.func @transform_5(%arg0: i32) -> (i32, i32) {
    %c0_i32 = arith.constant 0 : i32
    %c0_i32_0 = arith.constant 0 : i32
    %c0_i32_1 = arith.constant 0 : i32
    return %c0_i32, %c0_i32_0 : i32, i32
  }
  func.func @transform_6(%arg0: i32) -> (i32, i32) {
    %c0_i32 = arith.constant 0 : i32
    %c0_i32_0 = arith.constant 0 : i32
    %c0_i32_1 = arith.constant 0 : i32
    return %c0_i32, %c0_i32_0 : i32, i32
  }
  func.func @transform_7(%arg0: i32) -> (i32, i32) {
    %c0_i32 = arith.constant 0 : i32
    %c0_i32_0 = arith.constant 0 : i32
    %c0_i32_1 = arith.constant 0 : i32
    return %c0_i32, %c0_i32_0 : i32, i32
  }
  func.func @transform_8(%arg0: i32) -> (i32, i32) {
    %c0_i32 = arith.constant 0 : i32
    %c0_i32_0 = arith.constant 0 : i32
    %c0_i32_1 = arith.constant 0 : i32
    return %c0_i32, %c0_i32_0 : i32, i32
  }
  func.func @transform_9(%arg0: i32) -> (i32, i32) {
    %c0_i32 = arith.constant 0 : i32
    %c0_i32_0 = arith.constant 0 : i32
    %c0_i32_1 = arith.constant 0 : i32
    return %c0_i32, %c0_i32_0 : i32, i32
  }
  func.func @transform_10(%arg0: i32) -> (i32, i32) {
    %c0_i32 = arith.constant 0 : i32
    %c0_i32_0 = arith.constant 0 : i32
    return %arg0, %c0_i32 : i32, i32
  }
  func.func @transform_11(%arg0: i32) -> (i32, i32) {
    %c0_i32 = arith.constant 0 : i32
    %c0_i32_0 = arith.constant 0 : i32
    return %arg0, %c0_i32 : i32, i32
  }
}

</mosaic_0001>

<bundles_post_ra>
// kernel: _lambda_.1
= control target key start
LH: loop header
LB: loop body
LE: loop exit
PB: predicated region body
PF: predicated region fallthrough
CT: control target
= control target key end

     0   :  { %vm274_vm0 = vcmask 130048   ;;  %v2587_v28 = vmov 0   ;;  %vm638_vm1 = vcmask 1043456   ;;  %vm732_vm2 = vcmask 523264   ;;  %s2588_s17 = smov 64   ;;  %s3478_s2 = inlined_call_operand.vmem [shape: bf16[16,64], index: 2, kind: input, shape index: {}]   ;;  %s3479_s0 = inlined_call_operand.vmem [shape: bf16[512,16], index: 0, kind: input, shape index: {}]   ;;  %s3480_s3 = inlined_call_operand.vmem [shape: f32[1,64], index: 3, kind: input, shape index: {}]   ;;  %s3481_s4 = inlined_call_operand.vmem [shape: bf16[9,64,64], index: 4, kind: input, shape index: {}]   ;;  %s3482_s5 = inlined_call_operand.vmem [shape: f32[1,64], index: 5, kind: input, shape index: {}]   ;;  %s3483_s6 = inlined_call_operand.vmem [shape: bf16[256,128], index: 6, kind: input, shape index: {}]   ;;  %s3484_s8 = inlined_call_operand.vmem [shape: bf16[128,128], index: 8, kind: input, shape index: {}]   ;;  %s3485_s7 = inlined_call_operand.vmem [shape: f32[1,128], index: 7, kind: input, shape index: {}]   ;;  %s3486_s9 = inlined_call_operand.vmem [shape: f32[1,128], index: 9, kind: input, shape index: {}]   ;;  %s3487_s10 = inlined_call_operand.vmem [shape: f32[8,128], index: 10, kind: output, shape index: {0}]   ;;  %s3488_s1 = inlined_call_operand.vmem [shape: s32[8,1], index: 1, kind: input, shape index: {}]   ;;  %s3489_s11 = inlined_call_operand.vmem [shape: f32[8,1], index: 11, kind: output, shape index: {1}]  }
   0x1   :  { %v2510_v0 = vld [vmem:[%s3478_s2] sm:$0xff]  ;;  %v2479_v2 = vld [vmem:[%s3479_s0 + $0x8] sm:$0xff]  ;;  %v2480_v3 = vld [vmem:[%s3479_s0 + $0x10] sm:$0xff]  ;;  %2577 = vset.pattern.permute.xlu1 %v2587_v28  ;;  %2578 = vset.pattern.permute.xlu0 %v2587_v28  ;;  %vm1939_vm5 = vcmask 7168  }
   0x2   :  { %v2478_v1 = vld [vmem:[%s3479_s0] sm:$0xff]  ;;  %378 = vmatpush.bf16.msra.mxu0 %v2510_v0  ;;  %2572 = vmatpush.bf16.msra.mxu2 %v2510_v0  ;;  %v2481_v4 = vld [vmem:[%s3479_s0 + $0x18] sm:$0xff]  ;;  %v2483_v6 = vld [vmem:[%s3479_s0 + $0x28] sm:$0xff] }
   0x3   :  { %2571 = vmatpush.bf16.msra.mxu1 %v2510_v0  ;;  %2573 = vmatpush.bf16.msra.mxu3 %v2510_v0  ;;  %v2482_v5 = vld [vmem:[%s3479_s0 + $0x20] sm:$0xff]  ;;  %v2484_v7 = vld [vmem:[%s3479_s0 + $0x30] sm:$0xff]  ;;  %v2485_v8 = vld [vmem:[%s3479_s0 + $0x38] sm:$0xff] }
   0x4   :  { %v2507_v9 = vld [vmem:[%s3479_s0 + $0xe8] sm:$0xff]  ;;  %v2486_v10 = vld [vmem:[%s3479_s0 + $0x40] sm:$0xff]  ;;  %v2505_v13 = vld [vmem:[%s3479_s0 + $0xd8] sm:$0xff] }
   0x5   :  { %2081 = vmatmul.msk.bf16.vlgmr.msra.gmra.mxu0 %vm274_vm0, %v2478_v1  ;;  %2110 = vmatmul.msk.bf16.vlgmr.msra.gmra.mxu2 %vm274_vm0, %v2507_v9  ;;  %v2696_v12 = vld [vmem:[%s3480_s3] ss:$0 sm:$0xff]  ;;  %v2508_v14 = vld [vmem:[%s3479_s0 + $0xf0] sm:$0xff]  ;;  %v2514_v15 = vld [vmem:[%s3481_s4 + $0x18] sm:$0xff] }
   0x6   :  { %2108 = vmatmul.msk.bf16.vlgmr.msra.gmra.mxu1 %vm274_vm0, %v2505_v13  ;;  %836 = vmatpush.bf16.msrb.mxu2 %v2514_v15  ;;  %v2513_v20 = vld [vmem:[%s3481_s4 + $0x10] sm:$0xff]  ;;  %v2487_v21 = vld [vmem:[%s3479_s0 + $0x48] sm:$0xff]  ;;  %v2511_v24 = vld [vmem:[%s3481_s4] sm:$0xff] }
   0x7   :  { %v2512_v22 = vld [vmem:[%s3481_s4 + $0x8] sm:$0xff]  ;;  %v2506_v25 = vld [vmem:[%s3479_s0 + $0xe0] sm:$0xff]  ;;  %v2518_v26 = vld [vmem:[%s3481_s4 + $0x38] sm:$0xff] }
   0x8   :  { %751 = vmatpush.bf16.msrb.mxu1 %v2518_v26  ;;  %v2517_v32 = vld [vmem:[%s3481_s4 + $0x30] sm:$0xff]  ;;  %v2516_v34 = vld [vmem:[%s3481_s4 + $0x28] sm:$0xff]  ;;  %v2515_v36 = vld [vmem:[%s3481_s4 + $0x20] sm:$0xff] }
   0x9   :  { %v2488_v33 = vld [vmem:[%s3479_s0 + $0x50] sm:$0xff]  ;;  %v2509_v37 = vld [vmem:[%s3479_s0 + $0xf8] sm:$0xff]  ;;  %v2520_v45 = vld [vmem:[%s3481_s4 + $0x48] sm:$0xff] }
   0xa   :  { %837 = vmatpush.bf16.msrb.mxu2 %v2513_v20  ;;  %v2522_v38 = vld [vmem:[%s3481_s4 + $0x58] sm:$0xff]  ;;  %2112 = vmatmul.msk.bf16.vlgmr.msra.gmra.mxu3 %vm274_vm0, %v2509_v37  ;;  %v2521_v43 = vld [vmem:[%s3481_s4 + $0x50] sm:$0xff]  ;;  %v2519_v47 = vld [vmem:[%s3481_s4 + $0x40] sm:$0xff] }
   0xb   :  { %930 = vmatpush.bf16.msrb.mxu3 %v2522_v38  ;;  %v2489_v44 = vld [vmem:[%s3479_s0 + $0x58] sm:$0xff]  ;;  %v2490_v52 = vld [vmem:[%s3479_s0 + $0x60] sm:$0xff]  ;;  %v2491_v60 = vld [vmem:[%s3479_s0 + $0x68] sm:$0xff] }
   0xc   :  { %752 = vmatpush.bf16.msrb.mxu1 %v2517_v32 }
   0xe   :  { %838 = vmatpush.bf16.msrb.mxu2 %v2512_v22 }
   0xf   :  { %931 = vmatpush.bf16.msrb.mxu3 %v2521_v43 }
  0x10   :  { %753 = vmatpush.bf16.msrb.mxu1 %v2516_v34 }
  0x12   :  { %839 = vmatpush.bf16.msrb.mxu2 %v2511_v24 }
  0x13   :  { %932 = vmatpush.bf16.msrb.mxu3 %v2520_v45 }
  0x14   :  { %754 = vmatpush.bf16.msrb.mxu1 %v2515_v36 }
  0x15   :  { %2082 = vmatmul.msk.bf16.gmra.mxu0 %vm274_vm0, %v2479_v2  ;;  %2111 = vmatmul.msk.bf16.gmra.mxu2 %vm274_vm0, %v2508_v14 }
  0x16   :  { %2109 = vmatmul.msk.bf16.gmra.mxu1 %vm274_vm0, %v2506_v25 }
  0x17   :  { %933 = vmatpush.bf16.msrb.mxu3 %v2519_v47 }
  0x1a   :  { %934 = vmatmul.bf16.vlgmr.msrb.gmra.mxu3 %v2587_v28 }
  0x25   :  { %2083 = vmatmul.msk.bf16.gmra.mxu0 %vm274_vm0, %v2480_v3  ;;  %840 = vmatmul.bf16.vlgmr.msrb.gmra.mxu2 %v2587_v28 }
  0x26   :  { %755 = vmatmul.bf16.vlgmr.msrb.gmra.mxu1 %v2587_v28 }
  0x2a   :  { %939 = vmatmul.bf16.gmra.mxu3 %v2587_v28 }
  0x35   :  { %2084 = vmatmul.msk.bf16.gmra.mxu0 %vm274_vm0, %v2481_v4  ;;  %845 = vmatmul.bf16.gmra.mxu2 %v2587_v28 }
  0x36   :  { %760 = vmatmul.bf16.gmra.mxu1 %v2587_v28 }
  0x45   :  { %2085 = vmatmul.msk.bf16.gmra.mxu0 %vm274_vm0, %v2482_v5 }
  0x55   :  { %2086 = vmatmul.msk.bf16.gmra.mxu0 %vm274_vm0, %v2483_v6 }
  0x65   :  { %2087 = vmatmul.msk.bf16.gmra.mxu0 %vm274_vm0, %v2484_v7 }
  0x75   :  { %2088 = vmatmul.msk.bf16.gmra.mxu0 %vm274_vm0, %v2485_v8  ;;  %v2492_v8 = vld [vmem:[%s3479_s0 + $0x70] sm:$0xff] }
  0x82   :  { %v380_v11 = vpop.f32.mrf.mxu0 }
  0x83   :  { %v2710_v17 = vadd.f32 %v2696_v12, %v380_v11 }
  0x85   :  { %2089 = vmatmul.msk.bf16.gmra.mxu0 %vm274_vm0, %v2486_v10 }
  0x88   :  { %v2834_v32 = vpop.f32.mrf.mxu2 }
  0x8a   :  { %v382_v16 = vpop.f32.mrf.mxu0 }
  0x8b   :  { %v2713_v18 = vadd.f32 %v2696_v12, %v382_v16 }
  0x8d   :  { %v540_v19 = vmax.f32 %v2710_v17, %v2713_v18 }
  0x92   :  { %v385_v23 = vpop.f32.mrf.mxu0 }
  0x93   :  { %v2739_v29 = vadd.f32 %v2696_v12, %v385_v23 }
  0x95   :  { %2090 = vmatmul.msk.bf16.gmra.mxu0 %vm274_vm0, %v2487_v21  ;;  %v2493_v21 = vld [vmem:[%s3479_s0 + $0x78] sm:$0xff] }
  0x9a   :  { %v387_v27 = vpop.f32.mrf.mxu0 }
  0x9b   :  { %v2742_v30 = vadd.f32 %v2696_v12, %v387_v27 }
  0x9d   :  { %v545_v31 = vmax.f32 %v2739_v29, %v2742_v30 }
  0xa2   :  { %v390_v35 = vpop.f32.mrf.mxu0 }
  0xa3   :  { %v391_v40 = vadd.f32 %v2696_v12, %v390_v35  ;;  %v2494_v35 = vld [vmem:[%s3479_s0 + $0x80] sm:$0xff] }
  0xa5   :  { %2091 = vmatmul.msk.bf16.gmra.mxu0 %vm274_vm0, %v2488_v33 }
  0xaa   :  { %v392_v39 = vpop.f32.mrf.mxu0 }
  0xab   :  { %v393_v41 = vadd.f32 %v2696_v12, %v392_v39  ;;  %v2840_v39 = vpop.f32.mrf.mxu2 }
  0xad   :  { %v550_v42 = vmax.f32 %v391_v40, %v393_v41  ;;  %v515_v41 = vpop.f32.mrf.mxu1 }
  0xb2   :  { %v395_v46 = vpop.f32.mrf.mxu0 }
  0xb3   :  { %v396_v49 = vadd.f32 %v2696_v12, %v395_v46 }
  0xb5   :  { %2092 = vmatmul.msk.bf16.gmra.mxu0 %vm274_vm0, %v2489_v44 }
  0xba   :  { %v397_v48 = vpop.f32.mrf.mxu0 }
  0xbb   :  { %v398_v50 = vadd.f32 %v2696_v12, %v397_v48  ;;  %v2854_v48 = vpop.f32.mrf.mxu2 }
  0xbd   :  { %v555_v51 = vmax.f32 %v396_v49, %v398_v50  ;;  %v517_v49 = vpop.f32.mrf.mxu1  ;;  %v2495_v50 = vld [vmem:[%s3479_s0 + $0x88] sm:$0xff] }
  0xc2   :  { %v400_v53 = vpop.f32.mrf.mxu0 }
  0xc3   :  { %v401_v55 = vadd.f32 %v2696_v12, %v400_v53  ;;  %v2862_v53 = vpop.f32.mrf.mxu2 }
  0xc5   :  { %2093 = vmatmul.msk.bf16.gmra.mxu0 %vm274_vm0, %v2490_v52  ;;  %v2860_v52 = vpop.f32.mrf.mxu1 }
  0xca   :  { %v402_v54 = vpop.f32.mrf.mxu0 }
  0xcb   :  { %v403_v56 = vadd.f32 %v2696_v12, %v402_v54 }
  0xcd   :  { %v541_v57 = vmax.f32 %v401_v55, %v403_v56 }
  0xcf   :  { %v542_v58 = vmax.f32 %v540_v19, %v541_v57 }
  0xd1   :  { %v543_v59 = vmax.f32 %v542_v58, 0.0  ;;  %v2872_v58 = vpop.f32.mrf.mxu1 }
  0xd2   :  { %v405_v61 = vpop.f32.mrf.mxu0 }
  0xd3   :  { %v544_v62 = vpack.c.bf16 %v543_v59, %v543_v59  ;;  %v406_v3 = vadd.f32 %v2696_v12, %v405_v61  ;;  %v2496_v59 = vld [vmem:[%s3479_s0 + $0x90] sm:$0xff]  ;;  %v841_v61 = vpop.f32.mrf.mxu2 }
  0xd5   :  { %2094 = vmatmul.msk.bf16.gmra.mxu0 %vm274_vm0, %v2491_v60  ;;  %v621_v63 = vunpack.c.l.b16 %v544_v62 }
  0xd7   :  { %v622_v0 = vpack.c.b16 %v621_v63, %v621_v63 }
  0xd9   :  { %v2804_v1 = vsel %vm638_vm1, 0, %v622_v0 }
  0xda   :  { %v407_v2 = vpop.f32.mrf.mxu0  ;;  %2159 = vmatmul.msk.bf16.gmra.mxu2 %vm732_vm2, %v2804_v1 }
  0xdb   :  { %v408_v4 = vadd.f32 %v2696_v12, %v407_v2 }
  0xdd   :  { %v546_v5 = vmax.f32 %v406_v3, %v408_v4 }
  0xdf   :  { %v547_v6 = vmax.f32 %v545_v31, %v546_v5  ;;  %v2886_v5 = vpop.f32.mrf.mxu2 }
  0xe1   :  { %v548_v7 = vmax.f32 %v547_v6, 0.0  ;;  %v535_v6 = vpop.f32.mrf.mxu3 }
  0xe2   :  { %v410_v9 = vpop.f32.mrf.mxu0 }
  0xe3   :  { %v549_v10 = vpack.c.bf16 %v548_v7, %v548_v7  ;;  %v411_v16 = vadd.f32 %v2696_v12, %v410_v9  ;;  %v516_v9 = vadd.f32 %v2696_v12, %v515_v41 }
  0xe5   :  { %2095 = vmatmul.msk.bf16.gmra.mxu0 %vm274_vm0, %v2492_v8  ;;  %v664_v11 = vunpack.c.l.b16 %v549_v10  ;;  %v2497_v8 = vld [vmem:[%s3479_s0 + $0x98] sm:$0xff] }
  0xe7   :  { %v665_v13 = vpack.c.b16 %v664_v11, %v664_v11 }
  0xe9   :  { %v2815_v14 = vsel %vm638_vm1, %v544_v62, %v665_v13  ;;  %v756_v62 = vpop.f32.mrf.mxu1  ;;  %v536_v13 = vadd.f32 %v2696_v12, %v535_v6  ;;  %v2500_v6 = vld [vmem:[%s3479_s0 + $0xb0] sm:$0xff] }
  0xea   :  { %v412_v15 = vpop.f32.mrf.mxu0  ;;  %2137 = vmatmul.msk.bf16.gmra.mxu1 %vm732_vm2, %v2815_v14  ;;  %v842_v63 = vadd.f32 %v841_v61, %v756_v62 }
  0xeb   :  { %v413_v17 = vadd.f32 %v2696_v12, %v412_v15  ;;  %v537_v15 = vpop.f32.mrf.mxu3 }
  0xed   :  { %v551_v18 = vmax.f32 %v411_v16, %v413_v17  ;;  %v538_v17 = vadd.f32 %v2696_v12, %v537_v15 }
  0xef   :  { %v552_v19 = vmax.f32 %v550_v42, %v551_v18  ;;  %v846_v18 = vpop.f32.mrf.mxu2 }
  0xf1   :  { %v553_v20 = vmax.f32 %v552_v19, 0.0  ;;  %v2888_v7 = vpop.f32.mrf.mxu1 }
  0xf2   :  { %v415_v22 = vpop.f32.mrf.mxu0 }
  0xf3   :  { %v554_v23 = vpack.c.bf16 %v553_v20, %v553_v20  ;;  %v416_v29 = vadd.f32 %v2696_v12, %v415_v22  ;;  %v616_v20 = vmax.f32 %v536_v13, %v538_v17 }
  0xf5   :  { %2096 = vmatmul.msk.bf16.gmra.mxu0 %vm274_vm0, %v2493_v21  ;;  %v624_v24 = vunpack.c.l.b16 %v554_v23 }
  0xf7   :  { %v625_v25 = vpack.c.b16 %v624_v24, %v624_v24 }
  0xf9   :  { %v2826_v26 = vsel %vm638_vm1, %v549_v10, %v625_v25  ;;  %v518_v10 = vadd.f32 %v2696_v12, %v517_v49  ;;  %v761_v19 = vpop.f32.mrf.mxu1 }
  0xfa   :  { %v417_v27 = vpop.f32.mrf.mxu0  ;;  %2160 = vmatmul.msk.bf16.gmra.mxu2 %vm732_vm2, %v2826_v26  ;;  %2189 = vmatmul.msk.bf16.gmra.mxu3 %vm732_vm2, %v2826_v26  ;;  %v847_v21 = vadd.f32 %v846_v18, %v761_v19 }
  0xfb   :  { %v418_v30 = vadd.f32 %v2696_v12, %v417_v27  ;;  %v615_v16 = vmax.f32 %v516_v9, %v518_v10 }
  0xfd   :  { %v556_v31 = vmax.f32 %v416_v29, %v418_v30  ;;  %v2498_v29 = vld [vmem:[%s3479_s0 + $0xa0] sm:$0xff] }
  0xff   :  { %v557_v33 = vmax.f32 %v555_v51, %v556_v31  ;;  %v935_v31 = vpop.f32.mrf.mxu3 }
 0x101   :  { %v558_v34 = vmax.f32 %v557_v33, 0.0  ;;  %v2911_v33 = vadd.f32 %v935_v31, %v842_v63  ;;  %v2933_v62 = vpop.f32.mrf.mxu1 }
 0x102   :  { %v420_v36 = vpop.f32.mrf.mxu0 }
 0x103   :  { %v559_v37 = vpack.c.bf16 %v558_v34, %v558_v34  ;;  %v421_v45 = vadd.f32 %v2696_v12, %v420_v36 }
 0x105   :  { %2097 = vmatmul.msk.bf16.gmra.mxu0 %vm274_vm0, %v2494_v35  ;;  %v667_v38 = vunpack.c.l.b16 %v559_v37  ;;  %v2846_v43 = vsel %vm638_vm1, %v559_v37, 0 }
 0x107   :  { %v668_v40 = vpack.c.b16 %v667_v38, %v667_v38  ;;  %v2916_v37 = vpop.f32.mrf.mxu3 }
 0x109   :  { %v2843_v42 = vsel %vm638_vm1, %v554_v23, %v668_v40  ;;  %v2898_v23 = vmax.f32 %v615_v16, %v616_v20 }
 0x10a   :  { %v422_v44 = vpop.f32.mrf.mxu0  ;;  %2138 = vmatmul.msk.bf16.gmra.mxu1 %vm732_vm2, %v2843_v42  ;;  %2190 = vmatmul.msk.bf16.gmra.mxu3 %vm732_vm2, %v2846_v43 }
 0x10b   :  { %v423_v46 = vadd.f32 %v2696_v12, %v422_v44  ;;  %v2499_v44 = vld [vmem:[%s3479_s0 + $0xa8] sm:$0xff] }
 0x10d   :  { %v560_v47 = vmax.f32 %v421_v45, %v423_v46 }
 0x112   :  { %v425_v51 = vpop.f32.mrf.mxu0 }
 0x113   :  { %v2865_v55 = vadd.f32 %v2696_v12, %v425_v51 }
 0x115   :  { %2098 = vmatmul.msk.bf16.gmra.mxu0 %vm274_vm0, %v2495_v50  ;;  %v940_v50 = vpop.f32.mrf.mxu3 }
 0x11a   :  { %v427_v54 = vpop.f32.mrf.mxu0 }
 0x11b   :  { %v2868_v56 = vadd.f32 %v2696_v12, %v427_v54  ;;  %v2922_v54 = vadd.f32 %v940_v50, %v847_v21 }
 0x11d   :  { %v565_v57 = vmax.f32 %v2865_v55, %v2868_v56 }
 0x122   :  { %v430_v60 = vpop.f32.mrf.mxu0 }
 0x123   :  { %v2879_v2 = vadd.f32 %v2696_v12, %v430_v60  ;;  %v2931_v60 = vpop.f32.mrf.mxu2 }
 0x125   :  { %2099 = vmatmul.msk.bf16.gmra.mxu0 %vm274_vm0, %v2496_v59 }
 0x12a   :  { %v432_v0 = vpop.f32.mrf.mxu0 }
 0x12b   :  { %v2882_v3 = vadd.f32 %v2696_v12, %v432_v0 }
 0x12d   :  { %v570_v4 = vmax.f32 %v2879_v2, %v2882_v3 }
 0x132   :  { %v435_v11 = vpop.f32.mrf.mxu0 }
 0x133   :  { %v2901_v24 = vadd.f32 %v2696_v12, %v435_v11 }
 0x135   :  { %2100 = vmatmul.msk.bf16.gmra.mxu0 %vm274_vm0, %v2497_v8 }
 0x13a   :  { %v437_v22 = vpop.f32.mrf.mxu0 }
 0x13b   :  { %v2904_v25 = vadd.f32 %v2696_v12, %v437_v22 }
 0x13d   :  { %v575_v27 = vmax.f32 %v2901_v24, %v2904_v25 }
 0x142   :  { %v440_v30 = vpop.f32.mrf.mxu0 }
 0x143   :  { %v441_v35 = vadd.f32 %v2696_v12, %v440_v30 }
 0x145   :  { %2101 = vmatmul.msk.bf16.gmra.mxu0 %vm274_vm0, %v2498_v29  ;;  %v2501_v29 = vld [vmem:[%s3479_s0 + $0xb8] sm:$0xff] }
 0x14a   :  { %v442_v34 = vpop.f32.mrf.mxu0 }
 0x14b   :  { %v443_v36 = vadd.f32 %v2696_v12, %v442_v34  ;;  %v2952_v34 = vpop.f32.mrf.mxu3 }
 0x14d   :  { %v561_v38 = vmax.f32 %v441_v35, %v443_v36  ;;  %v2530_v36 = vld [vmem:[%s3481_s4 + $0x98] sm:$0xff] }
 0x14e   :  { %1157 = vmatpush.bf16.msra.mxu2 %v2530_v36  ;;  %v2525_v36 = vld [vmem:[%s3481_s4 + $0x70] sm:$0xff] }
 0x14f   :  { %v562_v40 = vmax.f32 %v560_v47, %v561_v38 }
 0x151   :  { %v563_v41 = vmax.f32 %v562_v40, 0.0 }
 0x152   :  { %v445_v45 = vpop.f32.mrf.mxu0 }
 0x153   :  { %v564_v46 = vpack.c.bf16 %v563_v41, %v563_v41  ;;  %v446_v47 = vadd.f32 %v2696_v12, %v445_v45  ;;  %v2534_v45 = vld [vmem:[%s3481_s4 + $0xb8] sm:$0xff] }
 0x154   :  { %1259 = vmatpush.bf16.msra.mxu3 %v2534_v45 }
 0x155   :  { %2102 = vmatmul.msk.bf16.gmra.mxu0 %vm274_vm0, %v2499_v44  ;;  %v627_v49 = vunpack.c.l.b16 %v564_v46 }
 0x157   :  { %v628_v51 = vpack.c.b16 %v627_v49, %v627_v49 }
 0x159   :  { %v2925_v55 = vsel %vm638_vm1, 0, %v628_v51 }
 0x15a   :  { %v447_v56 = vpop.f32.mrf.mxu0  ;;  %2161 = vmatmul.msk.bf16.gmra.mxu2 %vm732_vm2, %v2925_v55 }
 0x15b   :  { %v448_v59 = vadd.f32 %v2696_v12, %v447_v56 }
 0x15d   :  { %v566_v61 = vmax.f32 %v446_v47, %v448_v59  ;;  %v851_v11 = vpop.f32.mrf.mxu2  ;;  %v2502_v59 = vld [vmem:[%s3479_s0 + $0xc0] sm:$0xff] }
 0x15f   :  { %v567_v63 = vmax.f32 %v565_v57, %v566_v61 }
 0x161   :  { %v568_v0 = vmax.f32 %v567_v63, 0.0 }
 0x162   :  { %v450_v8 = vpop.f32.mrf.mxu0 }
 0x163   :  { %v569_v9 = vpack.c.bf16 %v568_v0, %v568_v0  ;;  %v451_v57 = vadd.f32 %v2696_v12, %v450_v8 }
 0x165   :  { %2103 = vmatmul.msk.bf16.gmra.mxu0 %vm274_vm0, %v2500_v6  ;;  %v670_v10 = vunpack.c.l.b16 %v569_v9  ;;  %v2975_v50 = vpop.f32.mrf.mxu2 }
 0x167   :  { %v766_v13 = vpop.f32.mrf.mxu1  ;;  %v671_v15 = vpack.c.b16 %v670_v10, %v670_v10 }
 0x168   :  { %v852_v16 = vadd.f32 %v851_v11, %v766_v13 }
 0x169   :  { %v2940_v17 = vsel %vm638_vm1, %v564_v46, %v671_v15  ;;  %v2526_v46 = vld [vmem:[%s3481_s4 + $0x78] sm:$0xff] }
 0x16a   :  { %v452_v18 = vpop.f32.mrf.mxu0  ;;  %2139 = vmatmul.msk.bf16.gmra.mxu1 %vm732_vm2, %v2940_v17 }
 0x16b   :  { %v453_v19 = vadd.f32 %v2696_v12, %v452_v18  ;;  %1043 = vmatpush.bf16.msra.mxu1 %v2526_v46  ;;  %v2528_v46 = vld [vmem:[%s3481_s4 + $0x88] sm:$0xff] }
 0x16d   :  { %v571_v20 = vmax.f32 %v451_v57, %v453_v19  ;;  %v2503_v19 = vld [vmem:[%s3479_s0 + $0xc8] sm:$0xff] }
 0x16f   :  { %v572_v21 = vmax.f32 %v570_v4, %v571_v20  ;;  %v2977_v51 = vpop.f32.mrf.mxu1  ;;  %1044 = vmatpush.bf16.msra.mxu1 %v2525_v36 }
 0x171   :  { %v573_v22 = vmax.f32 %v572_v21, 0.0  ;;  %v2529_v21 = vld [vmem:[%s3481_s4 + $0x90] sm:$0xff] }
 0x172   :  { %v455_v30 = vpop.f32.mrf.mxu0  ;;  %1158 = vmatpush.bf16.msra.mxu2 %v2529_v21 }
 0x173   :  { %v574_v31 = vpack.c.bf16 %v573_v22, %v573_v22  ;;  %v456_v4 = vadd.f32 %v2696_v12, %v455_v30 }
 0x175   :  { %v630_v35 = vunpack.c.l.b16 %v574_v31  ;;  %2104 = vmatmul.msk.bf16.gmra.mxu0 %vm274_vm0, %v2501_v29 }
 0x176   :  { %1159 = vmatpush.bf16.msra.mxu2 %v2528_v46  ;;  %v2531_v46 = vld [vmem:[%s3481_s4 + $0xa0] sm:$0xff] }
 0x177   :  { %v631_v38 = vpack.c.b16 %v630_v35, %v630_v35  ;;  %v2533_v35 = vld [vmem:[%s3481_s4 + $0xb0] sm:$0xff] }
 0x178   :  { %1260 = vmatpush.bf16.msra.mxu3 %v2533_v35 }
 0x179   :  { %v2959_v2 = vsel %vm638_vm1, %v569_v9, %v631_v38  ;;  %v2504_v38 = vld [vmem:[%s3479_s0 + $0xd0] sm:$0xff] }
 0x17a   :  { %v457_v3 = vpop.f32.mrf.mxu0  ;;  %2162 = vmatmul.msk.bf16.gmra.mxu2 %vm732_vm2, %v2959_v2  ;;  %2191 = vmatmul.msk.bf16.gmra.mxu3 %vm732_vm2, %v2959_v2 }
 0x17b   :  { %v458_v40 = vadd.f32 %v2696_v12, %v457_v3 }
 0x17d   :  { %v576_v41 = vmax.f32 %v456_v4, %v458_v40  ;;  %v945_v44 = vpop.f32.mrf.mxu3  ;;  %v856_v8 = vpop.f32.mrf.mxu2 }
 0x17e   :  { %v2973_v49 = vadd.f32 %v945_v44, %v852_v16 }
 0x17f   :  { %v577_v56 = vmax.f32 %v575_v27, %v576_v41 }
 0x181   :  { %v578_v47 = vmax.f32 %v577_v56, 0.0 }
 0x182   :  { %v460_v61 = vpop.f32.mrf.mxu0 }
 0x183   :  { %v579_v63 = vpack.c.bf16 %v578_v47, %v578_v47  ;;  %v461_v13 = vadd.f32 %v2696_v12, %v460_v61 }
 0x185   :  { %2105 = vmatmul.msk.bf16.gmra.mxu0 %vm274_vm0, %v2502_v59  ;;  %v2986_v0 = vpop.f32.mrf.mxu3  ;;  %v673_v6 = vunpack.c.l.b16 %v579_v63  ;;  %v2992_v25 = vsel %vm638_vm1, %v579_v63, 0 }
 0x187   :  { %v771_v9 = vpop.f32.mrf.mxu1  ;;  %v674_v10 = vpack.c.b16 %v673_v6, %v673_v6  ;;  %v2532_v6 = vld [vmem:[%s3481_s4 + $0xa8] sm:$0xff] }
 0x188   :  { %v857_v11 = vadd.f32 %v856_v8, %v771_v9  ;;  %v2524_v8 = vld [vmem:[%s3481_s4 + $0x68] sm:$0xff]  ;;  %1261 = vmatpush.bf16.msra.mxu3 %v2532_v6 }
 0x189   :  { %v2989_v24 = vsel %vm638_vm1, %v574_v31, %v674_v10  ;;  %1045 = vmatpush.bf16.msra.mxu1 %v2524_v8 }
 0x18a   :  { %v462_v27 = vpop.f32.mrf.mxu0  ;;  %2140 = vmatmul.msk.bf16.gmra.mxu1 %vm732_vm2, %v2989_v24  ;;  %2192 = vmatmul.msk.bf16.gmra.mxu3 %vm732_vm2, %v2992_v25 }
 0x18b   :  { %v463_v15 = vadd.f32 %v2696_v12, %v462_v27 }
 0x18c   :  { %1262 = vmatpush.bf16.msra.mxu3 %v2531_v46 }
 0x18d   :  { %v580_v16 = vmax.f32 %v461_v13, %v463_v15  ;;  %v950_v18 = vpop.f32.mrf.mxu3 }
 0x18e   :  { %v3000_v57 = vadd.f32 %v950_v18, %v857_v11 }
 0x192   :  { %v465_v20 = vpop.f32.mrf.mxu0 }
 0x193   :  { %v466_v29 = vadd.f32 %v2696_v12, %v465_v20 }
 0x195   :  { %2106 = vmatmul.msk.bf16.gmra.mxu0 %vm274_vm0, %v2503_v19 }
 0x19a   :  { %v467_v22 = vpop.f32.mrf.mxu0 }
 0x19b   :  { %v468_v30 = vadd.f32 %v2696_v12, %v467_v22  ;;  %v2527_v22 = vld [vmem:[%s3481_s4 + $0x80] sm:$0xff] }
 0x19c   :  { %1160 = vmatpush.bf16.msra.mxu2 %v2527_v22 }
 0x19d   :  { %v585_v31 = vmax.f32 %v466_v29, %v468_v30 }
 0x1a2   :  { %v470_v3 = vpop.f32.mrf.mxu0 }
 0x1a3   :  { %v471_v40 = vadd.f32 %v2696_v12, %v470_v3  ;;  %v3054_v3 = vpop.f32.mrf.mxu1 }
 0x1a5   :  { %2107 = vmatmul.msk.bf16.gmra.mxu0 %vm274_vm0, %v2504_v38  ;;  %v3052_v38 = vpop.f32.mrf.mxu2 }
 0x1aa   :  { %v472_v4 = vpop.f32.mrf.mxu0 }
 0x1ab   :  { %v473_v41 = vadd.f32 %v2696_v12, %v472_v4 }
 0x1ad   :  { %v590_v44 = vmax.f32 %v471_v40, %v473_v41 }
 0x1b2   :  { %v475_v45 = vpop.f32.mrf.mxu0 }
 0x1b3   :  { %v3027_v47 = vadd.f32 %v2696_v12, %v475_v45 }
 0x1ba   :  { %v477_v56 = vpop.f32.mrf.mxu0 }
 0x1bb   :  { %v3030_v59 = vadd.f32 %v2696_v12, %v477_v56  ;;  %v2523_v56 = vld [vmem:[%s3481_s4 + $0x60] sm:$0xff] }
 0x1bc   :  { %1046 = vmatpush.bf16.msra.mxu1 %v2523_v56 }
 0x1bd   :  { %v595_v61 = vmax.f32 %v3027_v47, %v3030_v59 }
 0x1c2   :  { %v480_v63 = vpop.f32.mrf.mxu0 }
 0x1c3   :  { %v481_v10 = vadd.f32 %v2696_v12, %v480_v63 }
 0x1ca   :  { %v482_v9 = vpop.f32.mrf.mxu0 }
 0x1cb   :  { %v483_v11 = vadd.f32 %v2696_v12, %v482_v9 }
 0x1cd   :  { %v581_v27 = vmax.f32 %v481_v10, %v483_v11 }
 0x1cf   :  { %v582_v13 = vmax.f32 %v580_v16, %v581_v27 }
 0x1d1   :  { %v583_v15 = vmax.f32 %v582_v13, 0.0 }
 0x1d2   :  { %v485_v18 = vpop.f32.mrf.mxu0 }
 0x1d3   :  { %v584_v19 = vpack.c.bf16 %v583_v15, %v583_v15  ;;  %v486_v35 = vadd.f32 %v2696_v12, %v485_v18 }
 0x1d5   :  { %v633_v20 = vunpack.c.l.b16 %v584_v19 }
 0x1d7   :  { %v634_v21 = vpack.c.b16 %v633_v20, %v633_v20 }
 0x1d9   :  { %v3046_v29 = vsel %vm638_vm1, 0, %v634_v21 }
 0x1da   :  { %v487_v30 = vpop.f32.mrf.mxu0  ;;  %2163 = vmatmul.msk.bf16.gmra.mxu2 %vm732_vm2, %v3046_v29 }
 0x1db   :  { %v488_v16 = vadd.f32 %v2696_v12, %v487_v30  ;;  %v3069_v30 = vpop.f32.mrf.mxu3 }
 0x1dd   :  { %v586_v36 = vmax.f32 %v486_v35, %v488_v16  ;;  %v861_v6 = vpop.f32.mrf.mxu2 }
 0x1df   :  { %v587_v4 = vmax.f32 %v585_v31, %v586_v36 }
 0x1e1   :  { %v588_v40 = vmax.f32 %v587_v4, 0.0 }
 0x1e2   :  { %v490_v41 = vpop.f32.mrf.mxu0 }
 0x1e3   :  { %v589_v45 = vpack.c.bf16 %v588_v40, %v588_v40  ;;  %v491_v27 = vadd.f32 %v2696_v12, %v490_v41 }
 0x1e5   :  { %v676_v63 = vunpack.c.l.b16 %v589_v45 }
 0x1e7   :  { %v776_v8 = vpop.f32.mrf.mxu1  ;;  %v677_v9 = vpack.c.b16 %v676_v63, %v676_v63  ;;  %v3085_v63 = vpop.f32.mrf.mxu2 }
 0x1e8   :  { %v862_v10 = vadd.f32 %v861_v6, %v776_v8 }
 0x1e9   :  { %v3063_v31 = vsel %vm638_vm1, %v584_v19, %v677_v9  ;;  %v2542_v19 = vld [vmem:[%s3481_s4 + $0xf8] sm:$0xff] }
 0x1ea   :  { %v492_v11 = vpop.f32.mrf.mxu0  ;;  %2141 = vmatmul.msk.bf16.gmra.mxu1 %vm732_vm2, %v3063_v31  ;;  %1455 = vmatpush.bf16.msrb.mxu2 %v2542_v19 }
 0x1eb   :  { %v493_v13 = vadd.f32 %v2696_v12, %v492_v11 }
 0x1ed   :  { %v591_v15 = vmax.f32 %v491_v27, %v493_v13 }
 0x1ef   :  { %v592_v18 = vmax.f32 %v590_v44, %v591_v15  ;;  %v3087_v6 = vpop.f32.mrf.mxu1  ;;  %v2546_v15 = vld [vmem:[%s3481_s4 + $0x118] sm:$0xff] }
 0x1f0   :  { %1553 = vmatpush.bf16.msrb.mxu3 %v2546_v15 }
 0x1f1   :  { %v593_v20 = vmax.f32 %v592_v18, 0.0 }
 0x1f2   :  { %v495_v21 = vpop.f32.mrf.mxu0 }
 0x1f3   :  { %v594_v22 = vpack.c.bf16 %v593_v20, %v593_v20  ;;  %v496_v44 = vadd.f32 %v2696_v12, %v495_v21 }
 0x1f5   :  { %v636_v35 = vunpack.c.l.b16 %v594_v22 }
 0x1f7   :  { %v637_v16 = vpack.c.b16 %v636_v35, %v636_v35 }
 0x1f9   :  { %v3075_v36 = vsel %vm638_vm1, %v589_v45, %v637_v16 }
 0x1fa   :  { %v497_v4 = vpop.f32.mrf.mxu0  ;;  %2164 = vmatmul.msk.bf16.gmra.mxu2 %vm732_vm2, %v3075_v36  ;;  %2193 = vmatmul.msk.bf16.gmra.mxu3 %vm732_vm2, %v3075_v36 }
 0x1fb   :  { %v498_v40 = vadd.f32 %v2696_v12, %v497_v4 }
 0x1fd   :  { %v596_v41 = vmax.f32 %v496_v44, %v498_v40  ;;  %v955_v46 = vpop.f32.mrf.mxu3  ;;  %v866_v18 = vpop.f32.mrf.mxu2  ;;  %v521_v44 = vadd.f32 %v2696_v12, %v2860_v52  ;;  %v523_v40 = vadd.f32 %v2696_v12, %v2872_v58 }
 0x1fe   :  { %v3083_v56 = vadd.f32 %v955_v46, %v862_v10  ;;  %v2538_v10 = vld [vmem:[%s3481_s4 + $0xd8] sm:$0xff] }
 0x1ff   :  { %v597_v45 = vmax.f32 %v595_v61, %v596_v41  ;;  %1357 = vmatpush.bf16.msrb.mxu1 %v2538_v10  ;;  %v601_v52 = vmax.f32 %v521_v44, %v523_v40  ;;  %v533_v44 = vadd.f32 %v2696_v12, %v2862_v53 }
 0x201   :  { %v598_v8 = vmax.f32 %v597_v45, 0.0  ;;  %v528_v45 = vadd.f32 %v2696_v12, %v2840_v39  ;;  %v2537_v39 = vld [vmem:[%s3481_s4 + $0xd0] sm:$0xff] }
 0x202   :  { %v500_v9 = vpop.f32.mrf.mxu0 }
 0x203   :  { %v599_v11 = vpack.c.bf16 %v598_v8, %v598_v8  ;;  %v501_v41 = vadd.f32 %v2696_v12, %v500_v9  ;;  %1358 = vmatpush.bf16.msrb.mxu1 %v2537_v39  ;;  %v2544_v39 = vld [vmem:[%s3481_s4 + $0x108] sm:$0xff] }
 0x205   :  { %v3092_v27 = vpop.f32.mrf.mxu3  ;;  %v679_v13 = vunpack.c.l.b16 %v599_v11  ;;  %v3104_v61 = vsel %vm638_vm1, %v599_v11, 0 }
 0x207   :  { %v781_v20 = vpop.f32.mrf.mxu1  ;;  %v680_v21 = vpack.c.b16 %v679_v13, %v679_v13 }
 0x208   :  { %v867_v47 = vadd.f32 %v866_v18, %v781_v20 }
 0x209   :  { %v3101_v59 = vsel %vm638_vm1, %v594_v22, %v680_v21  ;;  %v2541_v22 = vld [vmem:[%s3481_s4 + $0xf0] sm:$0xff] }
 0x20a   :  { %v502_v35 = vpop.f32.mrf.mxu0  ;;  %2142 = vmatmul.msk.bf16.gmra.mxu1 %vm732_vm2, %v3101_v59  ;;  %2194 = vmatmul.msk.bf16.gmra.mxu3 %vm732_vm2, %v3104_v61 }
 0x20b   :  { %2251 = vmatmul.msk.bf16.vlgmr.msra.gmra.mxu2 %vm732_vm2, %v2815_v14  ;;  %v503_v46 = vadd.f32 %v2696_v12, %v502_v35  ;;  %v526_v14 = vadd.f32 %v2696_v12, %v2834_v32  ;;  %v2545_v32 = vld [vmem:[%s3481_s4 + $0x110] sm:$0xff] }
 0x20c   :  { %1456 = vmatpush.bf16.msrb.mxu2 %v2541_v22  ;;  %1554 = vmatpush.bf16.msrb.mxu3 %v2545_v32  ;;  %v531_v22 = vadd.f32 %v2696_v12, %v2854_v48  ;;  %v2540_v48 = vld [vmem:[%s3481_s4 + $0xe8] sm:$0xff] }
 0x20d   :  { %v960_v19 = vpop.f32.mrf.mxu3  ;;  %v600_v58 = vmax.f32 %v501_v41, %v503_v46  ;;  %v606_v13 = vmax.f32 %v526_v14, %v528_v45 }
 0x20e   :  { %v3112_v16 = vadd.f32 %v960_v19, %v867_v47  ;;  %v611_v53 = vmax.f32 %v531_v22, %v533_v44 }
 0x20f   :  { %v602_v15 = vmax.f32 %v600_v58, %v601_v52 }
 0x210   :  { %1457 = vmatpush.bf16.msrb.mxu2 %v2540_v48  ;;  %1555 = vmatpush.bf16.msrb.mxu3 %v2544_v39 }
 0x211   :  { %v603_v21 = vmax.f32 %v602_v15, 0.0  ;;  %v2543_v15 = vld [vmem:[%s3481_s4 + $0x100] sm:$0xff] }
 0x212   :  { %v505_v4 = vpop.f32.mrf.mxu0 }
 0x213   :  { %v506_v8 = vadd.f32 %v2696_v12, %v505_v4  ;;  %v604_v19 = vpack.c.bf16 %v603_v21, %v603_v21 }
 0x214   :  { %1556 = vmatpush.bf16.msrb.mxu3 %v2543_v15 }
 0x21a   :  { %v507_v11 = vpop.f32.mrf.mxu0  ;;  %2219 = vmatmul.msk.bf16.vlgmr.msra.gmra.mxu1 %vm732_vm2, %v2804_v1  ;;  %2283 = vmatmul.msk.bf16.vlgmr.msra.gmra.mxu3 %vm732_vm2, %v2826_v26 }
 0x21b   :  { %v508_v9 = vadd.f32 %v2696_v12, %v507_v11  ;;  %2252 = vmatmul.msk.bf16.gmra.mxu2 %vm732_vm2, %v2843_v42  ;;  %v618_v42 = vmax.f32 %v2898_v23, 0.0 }
 0x21d   :  { %v605_v1 = vmax.f32 %v506_v8, %v508_v9  ;;  %v619_v23 = vpack.c.bf16 %v618_v42, %v618_v42  ;;  %v992_v42 = vunpack.c.l.b16 %v604_v19 }
 0x21f   :  { %v607_v10 = vmax.f32 %v605_v1, %v606_v13  ;;  %v1108_v11 = vunpack.c.l.b16 %v619_v23  ;;  %v2536_v13 = vld [vmem:[%s3481_s4 + $0xc8] sm:$0xff]  ;;  %v2539_v1 = vld [vmem:[%s3481_s4 + $0xe0] sm:$0xff]  ;;  %v993_v44 = vpack.c.b16 %v992_v42, %v992_v42 }
 0x220   :  { %1359 = vmatpush.bf16.msrb.mxu1 %v2536_v13  ;;  %1458 = vmatpush.bf16.msrb.mxu2 %v2539_v1 }
 0x221   :  { %v608_v18 = vmax.f32 %v607_v10, 0.0  ;;  %v1109_v58 = vpack.c.b16 %v1108_v11, %v1108_v11  ;;  %v2535_v10 = vld [vmem:[%s3481_s4 + $0xc0] sm:$0xff] }
 0x222   :  { %v510_v20 = vpop.f32.mrf.mxu0 }
 0x223   :  { %v609_v47 = vpack.c.bf16 %v608_v18, %v608_v18  ;;  %v511_v40 = vadd.f32 %v2696_v12, %v510_v20  ;;  %v3199_v18 = vpop.f32.mrf.mxu2  ;;  %v3201_v20 = vpop.f32.mrf.mxu1 }
 0x224   :  { %1360 = vmatpush.bf16.msrb.mxu1 %v2535_v10 }
 0x225   :  { %v1105_v35 = vunpack.c.l.b16 %v609_v47 }
 0x227   :  { %v1106_v4 = vpack.c.b16 %v1105_v35, %v1105_v35 }
 0x229   :  { %v3148_v41 = vsel %vm638_vm1, %v604_v19, %v1106_v4  ;;  %v3209_v4 = vpop.f32.mrf.mxu3 }
 0x22a   :  { %v512_v46 = vpop.f32.mrf.mxu0  ;;  %2220 = vmatmul.msk.bf16.gmra.mxu1 %vm732_vm2, %v2826_v26  ;;  %2284 = vmatmul.msk.bf16.gmra.mxu3 %vm732_vm2, %v2846_v43 }
 0x22b   :  { %v513_v14 = vadd.f32 %v2696_v12, %v512_v46  ;;  %2253 = vmatmul.msk.bf16.gmra.mxu2 %vm732_vm2, %v2940_v17 }
 0x22d   :  { %v610_v45 = vmax.f32 %v511_v40, %v513_v14  ;;  %v3212_v40 = vsel %vm638_vm1, 0, %v993_v44 }
 0x22f   :  { %v612_v8 = vmax.f32 %v610_v45, %v611_v53 }
 0x231   :  { %v613_v52 = vmax.f32 %v612_v8, 0.0 }
 0x233   :  { %v614_v26 = vpack.c.bf16 %v613_v52, %v613_v52 }
 0x235   :  { %v995_v9 = vunpack.c.l.b16 %v614_v26  ;;  %v3161_v43 = vsel %vm638_vm1, %v614_v26, %v1109_v58  ;;  %v3225_v58 = vsel %vm638_vm1, %v619_v23, 0 }
 0x237   :  { %v996_v12 = vpack.c.b16 %v995_v9, %v995_v9 }
 0x239   :  { %v3164_v32 = vsel %vm638_vm1, %v609_v47, %v996_v12 }
 0x23a   :  { %2221 = vmatmul.msk.bf16.gmra.mxu1 %vm732_vm2, %v2925_v55  ;;  %2285 = vmatmul.msk.bf16.gmra.mxu3 %vm732_vm2, %v2959_v2 }
 0x23b   :  { %2254 = vmatmul.msk.bf16.gmra.mxu2 %vm732_vm2, %v2989_v24 }
 0x24a   :  { %2222 = vmatmul.msk.bf16.gmra.mxu1 %vm732_vm2, %v2959_v2  ;;  %2286 = vmatmul.msk.bf16.gmra.mxu3 %vm732_vm2, %v2992_v25 }
 0x24b   :  { %2255 = vmatmul.msk.bf16.gmra.mxu2 %vm732_vm2, %v3063_v31 }
 0x25a   :  { %2223 = vmatmul.msk.bf16.gmra.mxu1 %vm732_vm2, %v3046_v29  ;;  %2287 = vmatmul.msk.bf16.gmra.mxu3 %vm732_vm2, %v3075_v36 }
 0x25b   :  { %2256 = vmatmul.msk.bf16.gmra.mxu2 %vm732_vm2, %v3101_v59 }
 0x25d   :  { %v871_v21 = vpop.f32.mrf.mxu2 }
 0x265   :  { %v873_v22 = vpop.f32.mrf.mxu2 }
 0x267   :  { %v786_v47 = vpop.f32.mrf.mxu1 }
 0x268   :  { %v872_v35 = vadd.f32 %v871_v21, %v786_v47 }
 0x26a   :  { %2224 = vmatmul.msk.bf16.gmra.mxu1 %vm732_vm2, %v3075_v36  ;;  %2288 = vmatmul.msk.bf16.gmra.mxu3 %vm732_vm2, %v3104_v61 }
 0x26b   :  { %2257 = vmatmul.msk.bf16.gmra.mxu2 %vm732_vm2, %v3148_v41 }
 0x26f   :  { %v788_v19 = vpop.f32.mrf.mxu1 }
 0x270   :  { %v874_v53 = vadd.f32 %v873_v22, %v788_v19 }
 0x27a   :  { %2225 = vmatmul.msk.bf16.gmra.mxu1 %vm732_vm2, %v3212_v40  ;;  %2289 = vmatmul.msk.bf16.gmra.mxu3 %vm732_vm2, %v3164_v32 }
 0x27b   :  { %2258 = vmatmul.msk.bf16.gmra.mxu2 %vm732_vm2, %v3161_v43 }
 0x27d   :  { %v876_v46 = vpop.f32.mrf.mxu2  ;;  %v965_v14 = vpop.f32.mrf.mxu3 }
 0x27e   :  { %v3220_v48 = vadd.f32 %v965_v14, %v872_v35  ;;  %v844_v35 = vadd.f32 %v2886_v5, %v2888_v7 }
 0x280   :  { %v976_v22 = vadd.f32 %v2916_v37, %v844_v35 }
 0x285   :  { %v878_v45 = vpop.f32.mrf.mxu2  ;;  %v967_v8 = vpop.f32.mrf.mxu3 }
 0x286   :  { %v3222_v11 = vadd.f32 %v967_v8, %v874_v53  ;;  %v849_v8 = vadd.f32 %v2931_v60, %v2933_v62 }
 0x287   :  { %v791_v52 = vpop.f32.mrf.mxu1 }
 0x288   :  { %v877_v26 = vadd.f32 %v876_v46, %v791_v52  ;;  %v978_v52 = vadd.f32 %v2952_v34, %v849_v8 }
 0x28a   :  { %2226 = vmatmul.msk.bf16.gmra.mxu1 %vm732_vm2, %v3164_v32  ;;  %2290 = vmatmul.msk.bf16.gmra.mxu3 %vm732_vm2, %v3225_v58 }
 0x28b   :  { %2345 = vmatmul.msk.bf16.vlgmr.msrb.gmra.mxu2 %vm732_vm2, %v2940_v17 }
 0x28d   :  { %v970_v9 = vpop.f32.mrf.mxu3 }
 0x28e   :  { %v3233_v12 = vadd.f32 %v970_v9, %v877_v26  ;;  %v1162_v39 = vpop.f32.mrf.mxu2 }
 0x28f   :  { %v793_v13 = vpop.f32.mrf.mxu1 }
 0x290   :  { %v879_v1 = vadd.f32 %v878_v45, %v793_v13 }
 0x295   :  { %v972_v15 = vpop.f32.mrf.mxu3 }
 0x296   :  { %v3235_v10 = vadd.f32 %v972_v15, %v879_v1  ;;  %v1164_v23 = vpop.f32.mrf.mxu2 }
 0x297   :  { %v1048_v21 = vpop.f32.mrf.mxu1 }
 0x298   :  { %v1088_v47 = vadd.f32 %v1048_v21, %v2911_v33 }
 0x29a   :  { %2315 = vmatmul.msk.bf16.vlgmr.msrb.gmra.mxu1 %vm732_vm2, %v2925_v55  ;;  %2375 = vmatmul.msk.bf16.vlgmr.msrb.gmra.mxu3 %vm732_vm2, %v2959_v2  ;;  %v1202_v17 = vadd.f32 %v1162_v39, %v1088_v47 }
 0x29b   :  { %2346 = vmatmul.msk.bf16.gmra.mxu2 %vm732_vm2, %v2989_v24 }
 0x29d   :  { %v1264_v42 = vpop.f32.mrf.mxu3 }
 0x29e   :  { %v1167_v44 = vpop.f32.mrf.mxu2  ;;  %v3247_v46 = vadd.f32 %v1264_v42, %v1202_v17 }
 0x29f   :  { %v1050_v33 = vpop.f32.mrf.mxu1 }
 0x2a0   :  { %v1089_v14 = vadd.f32 %v1050_v33, %v976_v22 }
 0x2a2   :  { %v1203_v19 = vadd.f32 %v1164_v23, %v1089_v14 }
 0x2a5   :  { %v1266_v5 = vpop.f32.mrf.mxu3 }
 0x2a6   :  { %v1169_v7 = vpop.f32.mrf.mxu2  ;;  %v3249_v53 = vadd.f32 %v1266_v5, %v1203_v19 }
 0x2a7   :  { %v1053_v55 = vpop.f32.mrf.mxu1 }
 0x2a8   :  { %v1090_v45 = vadd.f32 %v1053_v55, %v2922_v54 }
 0x2aa   :  { %2316 = vmatmul.msk.bf16.gmra.mxu1 %vm732_vm2, %v2959_v2  ;;  %2376 = vmatmul.msk.bf16.gmra.mxu3 %vm732_vm2, %v2992_v25  ;;  %v1204_v37 = vadd.f32 %v1167_v44, %v1090_v45 }
 0x2ab   :  { %2347 = vmatmul.msk.bf16.gmra.mxu2 %vm732_vm2, %v3063_v31  ;;  %v854_v31 = vadd.f32 %v2975_v50, %v2977_v51  ;;  %v859_v51 = vadd.f32 %v3052_v38, %v3054_v3 }
 0x2ad   :  { %v1269_v24 = vpop.f32.mrf.mxu3  ;;  %v980_v23 = vadd.f32 %v2986_v0, %v854_v31 }
 0x2ae   :  { %v1172_v26 = vpop.f32.mrf.mxu2  ;;  %v3261_v9 = vadd.f32 %v1269_v24, %v1204_v37 }
 0x2af   :  { %v1055_v54 = vpop.f32.mrf.mxu1 }
 0x2b0   :  { %v1091_v39 = vadd.f32 %v1055_v54, %v978_v52 }
 0x2b2   :  { %v1205_v13 = vadd.f32 %v1169_v7, %v1091_v39 }
 0x2b5   :  { %v1271_v60 = vpop.f32.mrf.mxu3 }
 0x2b6   :  { %v1174_v62 = vpop.f32.mrf.mxu2  ;;  %v3263_v1 = vadd.f32 %v1271_v60, %v1205_v13 }
 0x2b7   :  { %v1058_v2 = vpop.f32.mrf.mxu1 }
 0x2b8   :  { %v1092_v25 = vadd.f32 %v1058_v2, %v2973_v49 }
 0x2ba   :  { %2317 = vmatmul.msk.bf16.gmra.mxu1 %vm732_vm2, %v3046_v29  ;;  %2377 = vmatmul.msk.bf16.gmra.mxu3 %vm732_vm2, %v3075_v36  ;;  %v1206_v34 = vadd.f32 %v1172_v26, %v1092_v25 }
 0x2bb   :  { %2348 = vmatmul.msk.bf16.gmra.mxu2 %vm732_vm2, %v3101_v59  ;;  %v982_v59 = vadd.f32 %v3069_v30, %v859_v51 }
 0x2bd   :  { %v1274_v15 = vpop.f32.mrf.mxu3 }
 0x2be   :  { %v1177_v21 = vpop.f32.mrf.mxu2  ;;  %v3275_v47 = vadd.f32 %v1274_v15, %v1206_v34 }
 0x2bf   :  { %v1060_v49 = vpop.f32.mrf.mxu1 }
 0x2c0   :  { %v1093_v35 = vadd.f32 %v1060_v49, %v980_v23 }
 0x2c2   :  { %v1207_v17 = vadd.f32 %v1174_v62, %v1093_v35 }
 0x2c5   :  { %v1276_v29 = vpop.f32.mrf.mxu3 }
 0x2c6   :  { %v1179_v42 = vpop.f32.mrf.mxu2  ;;  %v3277_v22 = vadd.f32 %v1276_v29, %v1207_v17 }
 0x2c7   :  { %v1063_v44 = vpop.f32.mrf.mxu1 }
 0x2c8   :  { %v1094_v33 = vadd.f32 %v1063_v44, %v3000_v57 }
 0x2ca   :  { %2318 = vmatmul.msk.bf16.gmra.mxu1 %vm732_vm2, %v3075_v36  ;;  %2378 = vmatmul.msk.bf16.gmra.mxu3 %vm732_vm2, %v3104_v61  ;;  %v1208_v50 = vadd.f32 %v1177_v21, %v1094_v33 }
 0x2cb   :  { %2349 = vmatmul.msk.bf16.gmra.mxu2 %vm732_vm2, %v3148_v41 }
 0x2cd   :  { %v1279_v0 = vpop.f32.mrf.mxu3 }
 0x2ce   :  { %v1182_v14 = vpop.f32.mrf.mxu2  ;;  %v3289_v19 = vadd.f32 %v1279_v0, %v1208_v50 }
 0x2cf   :  { %v1065_v57 = vpop.f32.mrf.mxu1 }
 0x2d0   :  { %v1095_v5 = vadd.f32 %v1065_v57, %v982_v59 }
 0x2d2   :  { %v1209_v7 = vadd.f32 %v1179_v42, %v1095_v5 }
 0x2d5   :  { %v1281_v36 = vpop.f32.mrf.mxu3 }
 0x2d6   :  { %v3291_v55 = vpop.f32.mrf.mxu2  ;;  %v3293_v61 = vadd.f32 %v1281_v36, %v1209_v7 }
 0x2d7   :  { %v1068_v45 = vpop.f32.mrf.mxu1 }
 0x2d8   :  { %v1096_v41 = vadd.f32 %v1068_v45, %v3083_v56 }
 0x2da   :  { %2319 = vmatmul.msk.bf16.gmra.mxu1 %vm732_vm2, %v3212_v40  ;;  %2379 = vmatmul.msk.bf16.gmra.mxu3 %vm732_vm2, %v3164_v32  ;;  %v1210_v38 = vadd.f32 %v1182_v14, %v1096_v41 }
 0x2db   :  { %2350 = vmatmul.msk.bf16.gmra.mxu2 %vm732_vm2, %v3161_v43  ;;  %v869_v43 = vadd.f32 %v3199_v18, %v3201_v20 }
 0x2dd   :  { %v1284_v3 = vpop.f32.mrf.mxu3  ;;  %v986_v39 = vadd.f32 %v3209_v4, %v869_v43 }
 0x2de   :  { %v1187_v30 = vpop.f32.mrf.mxu2  ;;  %v3302_v8 = vadd.f32 %v1284_v3, %v1210_v38 }
 0x2df   :  { %v3304_v37 = vpop.f32.mrf.mxu1 }
 0x2e5   :  { %v3306_v24 = vpop.f32.mrf.mxu3 }
 0x2e6   :  { %v1189_v52 = vpop.f32.mrf.mxu2 }
 0x2e7   :  { %v1073_v56 = vpop.f32.mrf.mxu1 }
 0x2e8   :  { %v1098_v26 = vadd.f32 %v1073_v56, %v3112_v16 }
 0x2ea   :  { %2320 = vmatmul.msk.bf16.gmra.mxu1 %vm732_vm2, %v3164_v32  ;;  %2380 = vmatmul.msk.bf16.gmra.mxu3 %vm732_vm2, %v3225_v58  ;;  %v1212_v40 = vadd.f32 %v1187_v30, %v1098_v26 }
 0x2eb   :  { %1489 = vmatmul.bf16.gmra.mxu2 %v2587_v28 }
 0x2ed   :  { %v1289_v54 = vpop.f32.mrf.mxu3 }
 0x2ee   :  { %v1192_v13 = vpop.f32.mrf.mxu2  ;;  %v3317_v60 = vadd.f32 %v1289_v54, %v1212_v40 }
 0x2ef   :  { %v1075_v62 = vpop.f32.mrf.mxu1 }
 0x2f0   :  { %v1099_v16 = vadd.f32 %v1075_v62, %v986_v39 }
 0x2f2   :  { %v1213_v2 = vadd.f32 %v1189_v52, %v1099_v16 }
 0x2f5   :  { %v1291_v25 = vpop.f32.mrf.mxu3 }
 0x2f6   :  { %v1194_v32 = vpop.f32.mrf.mxu2  ;;  %v3319_v34 = vadd.f32 %v1291_v25, %v1213_v2 }
 0x2f7   :  { %v1078_v58 = vpop.f32.mrf.mxu1 }
 0x2f8   :  { %v1100_v31 = vadd.f32 %v1078_v58, %v3220_v48 }
 0x2fa   :  { %1391 = vmatmul.bf16.gmra.mxu1 %v2587_v28  ;;  %1587 = vmatmul.bf16.gmra.mxu3 %v2587_v28  ;;  %v1214_v18 = vadd.f32 %v1192_v13, %v1100_v31 }
 0x2fb   :  { %1494 = vmatmul.bf16.gmra.mxu2 %v2587_v28 }
 0x2fd   :  { %v1294_v20 = vpop.f32.mrf.mxu3 }
 0x2fe   :  { %v1197_v4 = vpop.f32.mrf.mxu2  ;;  %v3325_v15 = vadd.f32 %v1294_v20, %v1214_v18 }
 0x2ff   :  { %v1080_v23 = vpop.f32.mrf.mxu1 }
 0x300   :  { %v1101_v21 = vadd.f32 %v1080_v23, %v3222_v11 }
 0x302   :  { %v1215_v49 = vadd.f32 %v1194_v32, %v1101_v21 }
 0x305   :  { %v1296_v35 = vpop.f32.mrf.mxu3 }
 0x306   :  { %v1199_v17 = vpop.f32.mrf.mxu2  ;;  %v3328_v29 = vadd.f32 %v1296_v35, %v1215_v49 }
 0x307   :  { %v1083_v48 = vpop.f32.mrf.mxu1 }
 0x308   :  { %v1102_v42 = vadd.f32 %v1083_v48, %v3233_v12 }
 0x30a   :  { %1396 = vmatmul.bf16.gmra.mxu1 %v2587_v28  ;;  %1592 = vmatmul.bf16.gmra.mxu3 %v2587_v28  ;;  %v1216_v44 = vadd.f32 %v1197_v4, %v1102_v42 }
 0x30d   :  { %v1299_v33 = vpop.f32.mrf.mxu3 }
 0x30e   :  { %v3333_v50 = vadd.f32 %v1299_v33, %v1216_v44  ;;  %v1460_v51 = vpop.f32.mrf.mxu2 }
 0x30f   :  { %v1085_v0 = vpop.f32.mrf.mxu1 }
 0x310   :  { %v1103_v11 = vadd.f32 %v1085_v0, %v3235_v10  ;;  %v3343_v10 = vld [vmem:[%s3482_s5] ss:$0 sm:$0xff] }
 0x312   :  { %v1217_v59 = vadd.f32 %v1199_v17, %v1103_v11 }
 0x315   :  { %v1301_v14 = vpop.f32.mrf.mxu3 }
 0x316   :  { %v3336_v57 = vadd.f32 %v1301_v14, %v1217_v59  ;;  %v1462_v5 = vpop.f32.mrf.mxu2 }
 0x317   :  { %v1362_v7 = vpop.f32.mrf.mxu1 }
 0x318   :  { %v1402_v12 = vadd.f32 %v1362_v7, %v3247_v46 }
 0x31a   :  { %v1500_v36 = vadd.f32 %v1460_v51, %v1402_v12 }
 0x31d   :  { %v1558_v45 = vpop.f32.mrf.mxu3 }
 0x31e   :  { %v1465_v41 = vpop.f32.mrf.mxu2  ;;  %v1598_v28 = vadd.f32 %v1558_v45, %v1500_v36 }
 0x31f   :  { %v1364_v38 = vpop.f32.mrf.mxu1 }
 0x320   :  { %v1403_v3 = vadd.f32 %v1364_v38, %v3249_v53  ;;  %v1618_v43 = vadd.f32 %v3343_v10, %v1598_v28 }
 0x322   :  { %v1501_v30 = vadd.f32 %v1462_v5, %v1403_v3  ;;  %v864_v3 = vadd.f32 %v3085_v63, %v3087_v6 }
 0x325   :  { %v1560_v52 = vpop.f32.mrf.mxu3 }
 0x326   :  { %v1467_v56 = vpop.f32.mrf.mxu2  ;;  %v1599_v26 = vadd.f32 %v1560_v52, %v1501_v30  ;;  %v984_v52 = vadd.f32 %v3092_v27, %v864_v3 }
 0x327   :  { %v1367_v40 = vpop.f32.mrf.mxu1 }
 0x328   :  { %v1619_v46 = vadd.f32 %v3343_v10, %v1599_v26  ;;  %v1404_v54 = vadd.f32 %v1367_v40, %v3261_v9 }
 0x32a   :  { %v1634_v39 = vmax.f32 %v1618_v43, %v1619_v46  ;;  %v1502_v13 = vadd.f32 %v1465_v41, %v1404_v54 }
 0x32d   :  { %v1563_v62 = vpop.f32.mrf.mxu3 }
 0x32e   :  { %v1470_v53 = vpop.f32.mrf.mxu2  ;;  %v1600_v16 = vadd.f32 %v1563_v62, %v1502_v13 }
 0x32f   :  { %v1369_v2 = vpop.f32.mrf.mxu1 }
 0x330   :  { %v1405_v25 = vadd.f32 %v1369_v2, %v3263_v1  ;;  %v1620_v4 = vadd.f32 %v3343_v10, %v1600_v16 }
 0x332   :  { %v1503_v32 = vadd.f32 %v1467_v56, %v1405_v25 }
 0x335   :  { %v1565_v58 = vpop.f32.mrf.mxu3 }
 0x336   :  { %v1472_v31 = vpop.f32.mrf.mxu2  ;;  %v1601_v18 = vadd.f32 %v1565_v58, %v1503_v32 }
 0x337   :  { %v1372_v20 = vpop.f32.mrf.mxu1 }
 0x338   :  { %v1621_v23 = vadd.f32 %v3343_v10, %v1601_v18  ;;  %v1406_v21 = vadd.f32 %v1372_v20, %v3275_v47 }
 0x33a   :  { %v1639_v9 = vmax.f32 %v1620_v4, %v1621_v23  ;;  %v1504_v49 = vadd.f32 %v1470_v53, %v1406_v21 }
 0x33d   :  { %v1568_v35 = vpop.f32.mrf.mxu3 }
 0x33e   :  { %v1475_v17 = vpop.f32.mrf.mxu2  ;;  %v1602_v48 = vadd.f32 %v1568_v35, %v1504_v49 }
 0x33f   :  { %v1374_v42 = vpop.f32.mrf.mxu1 }
 0x340   :  { %v1407_v44 = vadd.f32 %v1374_v42, %v3277_v22  ;;  %v1622_v59 = vadd.f32 %v3343_v10, %v1602_v48 }
 0x342   :  { %v1505_v1 = vadd.f32 %v1472_v31, %v1407_v44 }
 0x345   :  { %v1570_v33 = vpop.f32.mrf.mxu3 }
 0x346   :  { %v1477_v51 = vpop.f32.mrf.mxu2  ;;  %v1603_v0 = vadd.f32 %v1570_v33, %v1505_v1 }
 0x347   :  { %v1377_v11 = vpop.f32.mrf.mxu1 }
 0x348   :  { %v1623_v14 = vadd.f32 %v3343_v10, %v1603_v0  ;;  %v1408_v5 = vadd.f32 %v1377_v11, %v3289_v19  ;;  %v1097_v19 = vadd.f32 %v3304_v37, %v984_v52 }
 0x34a   :  { %v1635_v47 = vmax.f32 %v1622_v59, %v1623_v14  ;;  %v1506_v7 = vadd.f32 %v1475_v17, %v1408_v5  ;;  %v1211_v13 = vadd.f32 %v3291_v55, %v1097_v19 }
 0x34c   :  { %v3356_v12 = vmax.f32 %v1634_v39, %v1635_v47  ;;  %v1313_v6 = vadd.f32 %v3306_v24, %v1211_v13  ;;  %v2558_v13 = vld [vmem:[%s3483_s6 + $0x58] sm:$0xff] }
 0x34d   :  { %v1573_v36 = vpop.f32.mrf.mxu3 }
 0x34e   :  { %v1604_v45 = vadd.f32 %v1573_v36, %v1506_v7  ;;  %v1480_v41 = vpop.f32.mrf.mxu2 }
 0x34f   :  { %v1379_v28 = vpop.f32.mrf.mxu1 }
 0x350   :  { %v1409_v22 = vadd.f32 %v1379_v28, %v3293_v61  ;;  %v1624_v40 = vadd.f32 %v3343_v10, %v1604_v45  ;;  %v2561_v45 = vld [vmem:[%s3483_s6 + $0x70] sm:$0xff] }
 0x352   :  { %v1507_v38 = vadd.f32 %v1477_v51, %v1409_v22 }
 0x355   :  { %v1575_v30 = vpop.f32.mrf.mxu3 }
 0x356   :  { %v1605_v56 = vadd.f32 %v1575_v30, %v1507_v38  ;;  %v1482_v54 = vpop.f32.mrf.mxu2 }
 0x357   :  { %v1382_v26 = vpop.f32.mrf.mxu1 }
 0x358   :  { %v1625_v43 = vadd.f32 %v3343_v10, %v1605_v56  ;;  %v1410_v46 = vadd.f32 %v1382_v26, %v3302_v8  ;;  %v2553_v56 = vld [vmem:[%s3483_s6 + $0x30] sm:$0xff]  ;;  %v2560_v26 = vld [vmem:[%s3483_s6 + $0x68] sm:$0xff] }
 0x35a   :  { %v1640_v39 = vmax.f32 %v1624_v40, %v1625_v43  ;;  %v1508_v61 = vadd.f32 %v1480_v41, %v1410_v46  ;;  %v2552_v43 = vld [vmem:[%s3483_s6 + $0x28] sm:$0xff] }
 0x35c   :  { %v3367_v62 = vmax.f32 %v1639_v9, %v1640_v39 }
 0x35d   :  { %v1578_v63 = vpop.f32.mrf.mxu3 }
 0x35e   :  { %v1606_v27 = vadd.f32 %v1578_v63, %v1508_v61  ;;  %v1485_v2 = vpop.f32.mrf.mxu2 }
 0x35f   :  { %v1384_v53 = vpop.f32.mrf.mxu1 }
 0x360   :  { %v1411_v16 = vadd.f32 %v1384_v53, %v1313_v6  ;;  %v1626_v8 = vadd.f32 %v3343_v10, %v1606_v27 }
 0x362   :  { %v1509_v37 = vadd.f32 %v1482_v54, %v1411_v16  ;;  %v2550_v16 = vld [vmem:[%s3483_s6 + $0x18] sm:$0xff] }
 0x365   :  { %v1580_v25 = vpop.f32.mrf.mxu3 }
 0x366   :  { %v1607_v32 = vadd.f32 %v1580_v25, %v1509_v37  ;;  %v1487_v20 = vpop.f32.mrf.mxu2  ;;  %v2557_v37 = vld [vmem:[%s3483_s6 + $0x50] sm:$0xff] }
 0x367   :  { %v1387_v58 = vpop.f32.mrf.mxu1 }
 0x368   :  { %v1627_v31 = vadd.f32 %v3343_v10, %v1607_v32  ;;  %v1412_v4 = vadd.f32 %v1387_v58, %v3317_v60  ;;  %v2562_v60 = vld [vmem:[%s3483_s6 + $0x78] sm:$0xff]  ;;  %v2549_v32 = vld [vmem:[%s3483_s6 + $0x10] sm:$0xff] }
 0x369   :  { %1817 = vmatpush.bf16.msra.mxu2 %v2562_v60  ;;  %v1637_v60 = vmax.f32 %v3356_v12, 0.0 }
 0x36a   :  { %v1644_v18 = vmax.f32 %v1626_v8, %v1627_v31  ;;  %v1510_v21 = vadd.f32 %v1485_v2, %v1412_v4  ;;  %v1642_v31 = vmax.f32 %v3367_v62, 0.0 }
 0x36d   :  { %v1583_v55 = vpop.f32.mrf.mxu3  ;;  %1818 = vmatpush.bf16.msra.mxu2 %v2561_v45 }
 0x36e   :  { %v1608_v9 = vadd.f32 %v1583_v55, %v1510_v21  ;;  %v1490_v35 = vpop.f32.mrf.mxu2 }
 0x36f   :  { %v1389_v23 = vpop.f32.mrf.mxu1 }
 0x370   :  { %v1413_v24 = vadd.f32 %v1389_v23, %v3319_v34  ;;  %v1628_v44 = vadd.f32 %v3343_v10, %v1608_v9  ;;  %v2554_v34 = vld [vmem:[%s3483_s6 + $0x38] sm:$0xff]  ;;  %v1643_v23 = vpack.c.bf16 %v1642_v31, %v1642_v31 }
 0x371   :  { %1804 = vmatpush.bf16.msra.mxu1 %v2554_v34  ;;  %1819 = vmatpush.bf16.msra.mxu2 %v2560_v26  ;;  %v2570_v9 = vld [vmem:[%s3484_s8 + $0x38] sm:$0xff]  ;;  %v2563_v34 = vld [vmem:[%s3484_s8] sm:$0xff] }
 0x372   :  { %v1511_v49 = vadd.f32 %v1487_v20, %v1413_v24  ;;  %v2555_v20 = vld [vmem:[%s3483_s6 + $0x40] sm:$0xff]  ;;  %v1655_v62 = vunpack.c.l.b16 %v1643_v23  ;;  %1900 = vmatpush.bf16.msra.mxu3 %v2570_v9 }
 0x373   :  { %v2547_v24 = vld [vmem:[%s3483_s6] sm:$0xff] }
 0x374   :  { %v1656_v21 = vpack.c.b16 %v1655_v62, %v1655_v62 }
 0x375   :  { %v1585_v17 = vpop.f32.mrf.mxu3  ;;  %1805 = vmatpush.bf16.msra.mxu1 %v2553_v56 }
 0x376   :  { %v1609_v48 = vadd.f32 %v1585_v17, %v1511_v49  ;;  %v1492_v14 = vpop.f32.mrf.mxu2  ;;  %v2569_v49 = vld [vmem:[%s3484_s8 + $0x30] sm:$0xff]  ;;  %v2567_v17 = vld [vmem:[%s3484_s8 + $0x20] sm:$0xff] }
 0x377   :  { %v1392_v42 = vpop.f32.mrf.mxu1  ;;  %1901 = vmatpush.bf16.msra.mxu3 %v2569_v49 }
 0x378   :  { %v1629_v1 = vadd.f32 %v3343_v10, %v1609_v48  ;;  %v1414_v33 = vadd.f32 %v1392_v42, %v3325_v15  ;;  %v2566_v48 = vld [vmem:[%s3484_s8 + $0x18] sm:$0xff] }
 0x379   :  { %1806 = vmatpush.bf16.msra.mxu1 %v2552_v43 }
 0x37a   :  { %v1649_v51 = vmax.f32 %v1628_v44, %v1629_v1  ;;  %v1512_v0 = vadd.f32 %v1490_v35, %v1414_v33  ;;  %v2568_v35 = vld [vmem:[%s3484_s8 + $0x28] sm:$0xff]  ;;  %v2565_v44 = vld [vmem:[%s3484_s8 + $0x10] sm:$0xff] }
 0x37b   :  { %1902 = vmatpush.bf16.msra.mxu3 %v2568_v35 }
 0x37d   :  { %v1588_v11 = vpop.f32.mrf.mxu3 }
 0x37e   :  { %v1610_v59 = vadd.f32 %v1588_v11, %v1512_v0  ;;  %v1495_v38 = vpop.f32.mrf.mxu2  ;;  %v1638_v11 = vpack.c.bf16 %v1637_v60, %v1637_v60 }
 0x37f   :  { %v1394_v5 = vpop.f32.mrf.mxu1  ;;  %1903 = vmatpush.bf16.msra.mxu3 %v2567_v17 }
 0x380   :  { %v1415_v47 = vadd.f32 %v1394_v5, %v3328_v29  ;;  %v1630_v28 = vadd.f32 %v3343_v10, %v1610_v59  ;;  %v2581_v5 = vld [vmem:[%s3485_s7] ss:$0 sm:$0xff] }
 0x382   :  { %v1513_v7 = vadd.f32 %v1492_v14, %v1415_v47 }
 0x383   :  { %1904 = vmatpush.bf16.msra.mxu3 %v2566_v48 }
 0x385   :  { %v1590_v15 = vpop.f32.mrf.mxu3 }
 0x386   :  { %v1611_v36 = vadd.f32 %v1590_v15, %v1513_v7  ;;  %v1497_v54 = vpop.f32.mrf.mxu2 }
 0x387   :  { %v1397_v41 = vpop.f32.mrf.mxu1  ;;  %1905 = vmatpush.bf16.msra.mxu3 %v2565_v44 }
 0x388   :  { %v1631_v22 = vadd.f32 %v3343_v10, %v1611_v36  ;;  %v1416_v29 = vadd.f32 %v1397_v41, %v3333_v50  ;;  %v2559_v50 = vld [vmem:[%s3483_s6 + $0x60] sm:$0xff] }
 0x389   :  { %1820 = vmatpush.bf16.msra.mxu2 %v2559_v50 }
 0x38a   :  { %v1645_v3 = vmax.f32 %v1630_v28, %v1631_v22  ;;  %v1514_v46 = vadd.f32 %v1495_v38, %v1416_v29  ;;  %v2582_v22 = vld [vmem:[%s3486_s9] ss:$0 sm:$0xff] }
 0x38c   :  { %v3389_v30 = vmax.f32 %v1644_v18, %v1645_v3  ;;  %v2548_v18 = vld [vmem:[%s3483_s6 + $0x8] sm:$0xff] }
 0x38d   :  { %v1593_v52 = vpop.f32.mrf.mxu3  ;;  %1821 = vmatpush.bf16.msra.mxu2 %v2558_v13  ;;  %v2589_v13 = vmov 0.0  }
 0x38e   :  { %v1612_v39 = vadd.f32 %v1593_v52, %v1514_v46  ;;  %v1647_v42 = vmax.f32 %v3389_v30, 0.0  ;;  %v1924_v52 = vld [vmem:[%s3488_s1] sm:$0xff] }
 0x38f   :  { %v1399_v19 = vpop.f32.mrf.mxu1  ;;  %vm1934_vm4 = vcmp.ge.s32.totalorder %v1924_v52, 0 }
 0x390   :  { %v1417_v40 = vadd.f32 %v1399_v19, %v3336_v57  ;;  %v2551_v57 = vld [vmem:[%s3483_s6 + $0x20] sm:$0xff]  ;;  %v1632_v27 = vadd.f32 %v3343_v10, %v1612_v39  ;;  %v1648_v1 = vpack.c.bf16 %v1647_v42, %v1647_v42 }
 0x391   :  { %1807 = vmatpush.bf16.msra.mxu1 %v2551_v57  ;;  %1822 = vmatpush.bf16.msra.mxu2 %v2557_v37 }
 0x392   :  { %v1515_v61 = vadd.f32 %v1497_v54, %v1417_v40  ;;  %v1925_v40 = vlaneseq }
 0x394   :  { %v1926_v43 = vand.u32 127, %v1925_v40 }
 0x395   :  { %v1595_v63 = vpop.f32.mrf.mxu3  ;;  %1808 = vmatpush.bf16.msra.mxu1 %v2550_v16 }
 0x396   :  { %v1613_v6 = vadd.f32 %v1595_v63, %v1515_v61  ;;  %v2477_v63 = vsel %vm1934_vm4, 1.0, %v2589_v13 }
 0x398   :  { %v1633_v53 = vadd.f32 %v3343_v10, %v1613_v6  ;;  %v2556_v10 = vld [vmem:[%s3483_s6 + $0x48] sm:$0xff] }
 0x399   :  { %1809 = vmatpush.bf16.msra.mxu1 %v2549_v32  ;;  %1823 = vmatpush.bf16.msra.mxu2 %v2556_v10 }
 0x39a   :  { %v1650_v2 = vmax.f32 %v1632_v27, %v1633_v53 }
 0x39c   :  { %v1651_v25 = vmax.f32 %v1649_v51, %v1650_v2  ;;  %v2564_v51 = vld [vmem:[%s3484_s8 + $0x8] sm:$0xff] }
 0x39d   :  { %1810 = vmatpush.bf16.msra.mxu1 %v2548_v18  ;;  %1824 = vmatpush.bf16.msra.mxu2 %v2555_v20 }
 0x39e   :  { %v1652_v58 = vmax.f32 %v1651_v25, 0.0  ;;  %1906 = vmatpush.bf16.msra.mxu3 %v2564_v51 }
 0x3a0   :  { %v1653_v8 = vpack.c.bf16 %v1652_v58, %v1652_v58 }
 0x3a1   :  { %1811 = vmatpush.bf16.msra.mxu1 %v2547_v24 }
 0x3a2   :  { %v1660_v55 = vunpack.c.l.b16 %v1653_v8  ;;  %1907 = vmatpush.bf16.msra.mxu3 %v2563_v34 }
 0x3a4   :  { %v1661_v4 = vpack.c.b16 %v1660_v55, %v1660_v55 }
 0x3a6   :  { %1662 = vrot.lane.b32.xlu0 %v1661_v4, %s2588_s17 }
 0x3ae   :  { %1657 = vrot.lane.b32.xlu0 %v1656_v21, %s2588_s17 }
 0x418   :  { %v1663_v33 = vpop.permute.xlu0 %1662 }
 0x419   :  { %v1670_v0 = vsel %vm732_vm2, %v1648_v1, %v1663_v33 }
 0x41a   :  { %1825 = vmatmul.bf16.vlgmr.msra.gmra.mxu2 %v1670_v0 }
 0x420   :  { %v1658_v59 = vpop.permute.xlu0 %1657 }
 0x421   :  { %v1666_v14 = vsel %vm732_vm2, %v1638_v11, %v1658_v59 }
 0x422   :  { %1812 = vmatmul.bf16.vlgmr.msra.gmra.mxu1 %v1666_v14 }
 0x49d   :  { %v1826_v47 = vpop.f32.mrf.mxu2 }
 0x49f   :  { %v1813_v7 = vpop.f32.mrf.mxu1 }
 0x4a0   :  { %v1814_v15 = vadd.f32 %v2581_v5, %v1813_v7 }
 0x4a2   :  { %v1827_v36 = vadd.f32 %v1826_v47, %v1814_v15 }
 0x4a4   :  { %v1830_v12 = vmax.f32 %v1827_v36, 0.0 }
 0x4a5   :  { %v1828_v45 = vpop.f32.mrf.mxu2 }
 0x4a6   :  { %v1831_v41 = vpack.c.bf16 %v1830_v12, %v1830_v12 }
 0x4a7   :  { %v1815_v28 = vpop.f32.mrf.mxu1 }
 0x4a8   :  { %1908 = vmatmul.bf16.vlgmr.msra.gmra.mxu3 %v1831_v41 }
 0x52b   :  { %v1909_v38 = vpop.f32.mrf.mxu3 }
 0x52c   :  { %v1910_v3 = vadd.f32 %v2582_v22, %v1909_v38 }
 0x52e   :  { %1913 = vst [vmem:[%s3487_s10] sm:$0xff] %v1910_v3  ;;  %1914 = vmax.xlane.f32.xlu1 %v1910_v3 }
 0x533   :  { %v1911_v30 = vpop.f32.mrf.mxu3 }
 0x547   :  { %1928 = vperm.xlu1 %2577, %v1924_v52  }
 0x5a1   :  { %v1915_v29 = vpop.xlane.xlu1 %1914 }
 0x5a2   :  { %v1916_v56 = vsub.f32 %v1910_v3, %v1915_v29 }
 0x5a4   :  { %v1917_v26 = vmul.f32 1.442695, %v1916_v56 }
 0x5a6   :  { %2583 = vpow2.f32 %v1917_v26 }
 0x5ac   :  { %v2584_v19 = vpop.eup %2583 }
 0x5ad   :  { %1919 = vadd.xlane.f32.xlu2 %v2584_v19 }
 0x5b9   :  { %v1929_v50 = vpop.permute.xlu1 %1928 }
 0x5ba   :  { %vm1930_vm3 = vcmp.eq.s32.totalorder %v1926_v43, %v1929_v50 }
 0x5bb   :  { %v1931_v46 = vsel %vm1930_vm3, %v1910_v3, 0.0 }
 0x5bc   :  { %1932 = vadd.xlane.f32.xlu2 %v1931_v46 }
 0x620   :  { %v1920_v54 = vpop.xlane.xlu2 %1919 }
 0x621   :  { %2585 = vlog2.f32 %v1920_v54 }
 0x627   :  { %v2586_v39 = vpop.eup %2585 }
 0x628   :  { %v1922_v61 = vmul.f32 0.6931472, %v2586_v39 }
 0x62a   :  { %v1923_v57 = vadd.f32 %v1922_v61, %v1915_v29 }
 0x62f   :  { %v1933_v6 = vpop.xlane.xlu2 %1932 }
 0x630   :  { %v1937_v27 = vsub.f32 %v1923_v57, %v1933_v6 }
 0x632   :  { %v1938_v53 = vmul.f32 %v2477_v63, %v1937_v27 }
 0x634   :  { %1940 = vst.msk [vmem:[%s3489_s11] sm:$0xff] %vm1939_vm5, %v1938_v53 }

</bundles_post_ra>
